<compile_context>
chip_gen: v7x
topology: tpu7x:2x2x1
jax: 0.10.0
libtpu: 0.0.40
codegen_flags: <defaults>
</compile_context>

<pallas_src>
import functools

import jax
import jax.numpy as jnp
from jax import lax
from jax.experimental import pallas as pl
from jax.experimental.pallas import tpu as pltpu


# ---------------------------------------------------------------------------
# Kernel: conv (big-K stacked matmul) + bias + ReLU + fused BN partial stats
# ---------------------------------------------------------------------------
def conv_relu_stats_kernel(w_ref, b_ref, mask_ref, xa_ref, xh_ref,
                           y_ref, stats_ref, xstk_ref, *, offsets, tile_m, cin):
    """One (batch, flat-tile) grid step.

    w_ref    : (cout, K_pad)          tap-stacked weight matrix (zero-padded K)
    b_ref    : (cout, 1)              conv bias (f32)
    mask_ref : (1, tile_m)            1.0 on valid output voxels, 0.0 elsewhere
    xa_ref   : (PH, 1, cin, tile_m)   flat input, tile i
    xh_ref   : (PH, 1, cin, halo_w)   flat input halo (start of tile i+1)
    y_ref    : (1, cout, tile_m)      conv + bias + ReLU output tile (lane dense)
    stats_ref: (1, cout, 2)           per-batch masked [sum, sum_sq] (accumulated)
    xstk_ref : (K_pad, tile_m)        VMEM scratch: K-stacked shifted input
    """
    used_phases = sorted({ph for ph, _ in offsets})
    # Current tile ++ halo per stride phase: (cin, tile_m + halo_w).
    xc = {ph: jnp.concatenate([xa_ref[ph, 0], xh_ref[ph, 0]], axis=-1)
          for ph in used_phases}

    # Build the big-K operand: row block o holds tap o's shifted window.
    for o, (ph, shift) in enumerate(offsets):                 # static unroll
        xstk_ref[pl.ds(o * cin, cin), :] = xc[ph][:, shift:shift + tile_m]

    # Zero the K-padding rows (their weights are zero, but keep data defined).
    n_taps = len(offsets)
    kpad_rows = xstk_ref.shape[0] - n_taps * cin
    if kpad_rows:
        xstk_ref[pl.ds(n_taps * cin, kpad_rows), :] = jnp.zeros(
            (kpad_rows, tile_m), xstk_ref.dtype)

    # One big-K MXU matmul: (cout, K_pad) x (K_pad, tile_m) -> f32.
    acc = jnp.dot(w_ref[...], xstk_ref[...], preferred_element_type=jnp.float32)
    acc = jnp.maximum(acc + b_ref[...], 0.0)                  # bias + ReLU, f32
    y_ref[0] = acc.astype(y_ref.dtype)

    # Masked BN partial statistics (junk / padded voxels excluded), accumulated
    # across the tile grid axis in the resident stats output block.
    am = acc * mask_ref[...]
    s1 = jnp.sum(am, axis=1, keepdims=True)                   # (cout, 1)
    s2 = jnp.sum(am * acc, axis=1, keepdims=True)             # (cout, 1); mask is 0/1
    part = jnp.concatenate([s1, s2], axis=1)                  # (cout, 2)

    @pl.when(pl.program_id(1) == 0)
    def _():
        stats_ref[0] = jnp.zeros_like(stats_ref[0])

    stats_ref[0] += part


# ---------------------------------------------------------------------------
# Wrapper: CRB3d forward
# ---------------------------------------------------------------------------
def crb3d_forward(x, w, b, gamma, beta, *, stride, padding, eps=1e-5,
                  tile_m=1024, compute_dtype=jnp.bfloat16):
    """x: (N, cin, D, H, W); w: (cout, cin, kd, kh, kw); returns NCDHW f32."""
    n, cin, D, H, W = x.shape
    cout, _, kd, kh, kw = w.shape
    s, p = int(stride), int(padding)

    OD = (D + 2 * p - kd) // s + 1
    OH = (H + 2 * p - kh) // s + 1
    OW = (W + 2 * p - kw) // s + 1
    Dp, Hp, Wp = D + 2 * p, H + 2 * p, W + 2 * p
    Dq, Hq, Wq = -(-Dp // s), -(-Hp // s), -(-Wp // s)     # stride-phase grid
    Lq = Dq * Hq * Wq
    PH = s * s * s
    kvol = kd * kh * kw

    # ---- glue: zero-pad, split stride phases, flatten spatial ---------------
    xp = jnp.pad(x, ((0, 0), (0, 0),
                     (p, s * Dq - D - p), (p, s * Hq - H - p), (p, s * Wq - W - p)))
    xq = xp.reshape(n, cin, Dq, s, Hq, s, Wq, s)
    xq = jnp.transpose(xq, (3, 5, 7, 0, 1, 2, 4, 6))       # (s,s,s,N,cin,Dq,Hq,Wq)
    xflat = xq.reshape(PH, n, cin, Lq)

    # Per-tap (stride-phase, flat shift) -- static python ints.
    offsets = []
    for a in range(kd):
        for bh in range(kh):
            for c in range(kw):
                ph = (a % s) * s * s + (bh % s) * s + (c % s)
                shift = (a // s) * Hq * Wq + (bh // s) * Wq + (c // s)
                offsets.append((ph, shift))
    max_shift = max(sh for _, sh in offsets)

    # Halo block width (lane aligned); tile_m is a multiple of it so the halo
    # block is addressed with plain block indices.
    halo_w = max(128, ((max_shift + 127) // 128) * 128)
    tile_m = max(128, int(tile_m))
    tile_m = ((max(tile_m, halo_w) + halo_w - 1) // halo_w) * halo_w
    num_tiles = (Lq + tile_m - 1) // tile_m
    m_out = num_tiles * tile_m
    lpad = (num_tiles + 1) * tile_m        # +1 tile so the halo block always exists
    nhalo = tile_m // halo_w

    xflat = jnp.pad(xflat, ((0, 0), (0, 0), (0, 0), (0, lpad - Lq))).astype(compute_dtype)

    # Validity mask: 1.0 where the flat position is a real output voxel.
    mask = jnp.pad(jnp.ones((OD, OH, OW), jnp.float32),
                   ((0, Dq - OD), (0, Hq - OH), (0, Wq - OW))).reshape(1, Lq)
    mask = jnp.pad(mask, ((0, 0), (0, lpad - Lq)))

    # Tap-stacked weights (cout, K), zero-padded to a sublane-friendly K_pad.
    K = kvol * cin
    K_pad = ((K + 15) // 16) * 16
    w2d = jnp.transpose(w, (0, 2, 3, 4, 1)).reshape(cout, K)
    w2d = jnp.pad(w2d, ((0, 0), (0, K_pad - K))).astype(compute_dtype)
    bias = b.reshape(cout, 1).astype(jnp.float32)

    item = jnp.dtype(compute_dtype).itemsize
    cost = pl.CostEstimate(
        flops=int(2 * n * m_out * kvol * cin * cout),
        transcendentals=0,
        bytes_accessed=int(PH * n * cin * (m_out + num_tiles * halo_w) * item  # x + halo
                           + cout * K_pad * item                               # weights
                           + n * m_out * 4                                     # mask
                           + n * cout * m_out * item                           # conv out
                           + n * cout * 2 * 4))                                # stats

    # VMEM budget from actual buffer sizes (double-buffered blocks + scratch
    # + f32 intermediates), with headroom, clamped to a sane range.
    vmem_bytes = (2 * PH * cin * tile_m * item        # xa tiles
                  + 2 * PH * cin * halo_w * item      # halo tiles
                  + 2 * cout * K_pad * item           # weights
                  + 2 * cout * 4                      # bias
                  + 2 * tile_m * 4                    # mask
                  + 2 * cout * tile_m * item          # y out
                  + 2 * cout * 2 * 4                  # stats out
                  + K_pad * tile_m * item             # xstk scratch
                  + 8 * cout * tile_m * 4)            # f32 intermediates headroom
    vmem_limit = int(min(100 * 1024 * 1024, max(32 * 1024 * 1024, 2 * vmem_bytes)))

    # ---- Pallas: conv + bias + ReLU + fused BN partial statistics -----------
    yf, stats = pl.pallas_call(
        functools.partial(conv_relu_stats_kernel,
                          offsets=tuple(offsets), tile_m=tile_m, cin=cin),
        grid=(n, num_tiles),
        in_specs=[
            pl.BlockSpec((cout, K_pad), lambda ni, i: (0, 0)),
            pl.BlockSpec((cout, 1), lambda ni, i: (0, 0)),
            pl.BlockSpec((1, tile_m), lambda ni, i: (0, i)),
            pl.BlockSpec((PH, 1, cin, tile_m), lambda ni, i: (0, ni, 0, i)),
            pl.BlockSpec((PH, 1, cin, halo_w),
                         lambda ni, i: (0, ni, 0, (i + 1) * nhalo)),
        ],
        out_specs=[
            pl.BlockSpec((1, cout, tile_m), lambda ni, i: (ni, 0, i)),
            pl.BlockSpec((1, cout, 2), lambda ni, i: (ni, 0, 0)),
        ],
        out_shape=[
            jax.ShapeDtypeStruct((n, cout, m_out), compute_dtype),
            jax.ShapeDtypeStruct((n, cout, 2), jnp.float32),
        ],
        scratch_shapes=[pltpu.VMEM((K_pad, tile_m), compute_dtype)],
        compiler_params=pltpu.CompilerParams(
            dimension_semantics=("parallel", "arbitrary"),
            vmem_limit_bytes=vmem_limit),
        cost_estimate=cost,
    )(w2d, bias, mask, xflat, xflat)

    # ---- BN batch statistics (training mode, biased variance) ---------------
    count = float(n * OD * OH * OW)
    sums = jnp.sum(stats, axis=0)                            # (cout, 2) f32
    mean = sums[:, 0] / count
    var = jnp.maximum(sums[:, 1] / count - mean * mean, 0.0)
    inv = lax.rsqrt(var + eps)
    g = gamma.astype(jnp.float32)
    scale = (g * inv).reshape(1, cout, 1, 1, 1)
    shift = (beta.astype(jnp.float32) - mean * g * inv).reshape(1, cout, 1, 1, 1)
    # TODO(synk): nn.BatchNorm3d also updates running_mean / running_var buffers
    # (training-time module state); that side effect is not part of the output.

    # ---- BN affine + un-flatten + crop: one fused XLA elementwise pass -------
    yv = yf[:, :, :Lq].reshape(n, cout, Dq, Hq, Wq)[:, :, :OD, :OH, :OW]
    return yv.astype(jnp.float32) * scale + shift


# ---------------------------------------------------------------------------
# Pure-JAX reference (mirrors the PyTorch forward) for correctness checks
# ---------------------------------------------------------------------------
def crb3d_reference(x, w, b, gamma, beta, *, stride, padding, eps=1e-5):
    cout = w.shape[0]
    conv = lax.conv_general_dilated(
        x, w, (stride,) * 3, [(padding, padding)] * 3,
        dimension_numbers=("NCDHW", "OIDHW", "NCDHW"))
    conv = conv + b.reshape(1, cout, 1, 1, 1)
    r = jnp.maximum(conv, 0.0)
    mean = r.mean(axis=(0, 2, 3, 4), keepdims=True)
    var = r.var(axis=(0, 2, 3, 4), keepdims=True)            # biased (training BN)
    return ((r - mean) * lax.rsqrt(var + eps)
            * gamma.reshape(1, cout, 1, 1, 1) + beta.reshape(1, cout, 1, 1, 1))


if __name__ == "__main__":
    # CRB3d(cin=4, cout=8, k=3, s=1, p=1)
    cin, cout, k, s, p = 4, 8, 3, 1, 1
    N, D, H, W = 2, 8, 8, 8

    key = jax.random.PRNGKey(0)
    kx, kw_, kb, kg, kbe = jax.random.split(key, 5)
    x = jax.random.normal(kx, (N, cin, D, H, W), dtype=jnp.float32)
    w = 0.1 * jax.random.normal(kw_, (cout, cin, k, k, k), dtype=jnp.float32)
    b = 0.1 * jax.random.normal(kb, (cout,), dtype=jnp.float32)
    gamma = 1.0 + 0.1 * jax.random.normal(kg, (cout,), dtype=jnp.float32)
    beta = 0.1 * jax.random.normal(kbe, (cout,), dtype=jnp.float32)

    ref = crb3d_reference(x, w, b, gamma, beta, stride=s, padding=p)

    # f32 compute path: algorithmic correctness at tight tolerance.
    fwd_f32 = jax.jit(functools.partial(crb3d_forward, stride=s, padding=p,
                                        compute_dtype=jnp.float32))
    out_f32 = jax.block_until_ready(fwd_f32(x, w, b, gamma, beta))
    assert out_f32.shape == ref.shape == (N, cout, D, H, W)
    err32 = float(jnp.max(jnp.abs(out_f32 - ref)))
    assert err32 < 2e-3, f"f32 path max abs err = {err32}"

    # bf16 compute path (default, bandwidth-optimized): tolerance sized for
    # bf16 operand / stored-activation rounding.
    fwd_bf16 = jax.jit(functools.partial(crb3d_forward, stride=s, padding=p,
                                         compute_dtype=jnp.bfloat16))
    out_bf16 = jax.block_until_ready(fwd_bf16(x, w, b, gamma, beta))
    assert out_bf16.shape == ref.shape
    err16 = float(jnp.max(jnp.abs(out_bf16 - ref)))
    assert err16 < 1e-1, f"bf16 path max abs err = {err16}"

    print("KERNEL_OK")
</pallas_src>

<mosaic_0001>
module attributes {stable_mosaic.version = 11 : i64} {
  func.func @conv_relu_stats_kernel(%arg0: i32, %arg1: i32, %arg2: memref<8x112xf32, #tpu.memory_space<vmem>>, %arg3: memref<8x1xf32, #tpu.memory_space<vmem>>, %arg4: memref<1x1024xf32, #tpu.memory_space<vmem>>, %arg5: memref<1x1x4x1024xf32, #tpu.memory_space<vmem>>, %arg6: memref<1x1x4x256xf32, #tpu.memory_space<vmem>>, %arg7: memref<1x8x1024xf32, #tpu.memory_space<vmem>>, %arg8: memref<1x8x2xf32, #tpu.memory_space<vmem>>, %arg9: memref<112x1024xf32, #tpu.memory_space<vmem>>) attributes {dimension_semantics = [#tpu.dimension_semantics<parallel>, #tpu.dimension_semantics<arbitrary>], iteration_bounds = array<i64: 2, 1>, scalar_prefetch = 0 : i64, scratch_operands = 1 : i64, tpu.core_type = #tpu.core_type<tc>, window_params = [{pipeline_mode = #tpu.pipeline_mode<synchronous>, transform_indices = @transform_0, window_bounds = array<i64: 8, 112>}, {pipeline_mode = #tpu.pipeline_mode<synchronous>, transform_indices = @transform_1, window_bounds = array<i64: 8, 1>}, {transform_indices = @transform_2, window_bounds = array<i64: 1, 1024>}, {transform_indices = @transform_3, window_bounds = array<i64: 1, 1, 4, 1024>}, {transform_indices = @transform_4, window_bounds = array<i64: 1, 1, 4, 256>}, {transform_indices = @transform_5, window_bounds = array<i64: 1, 8, 1024>}, {transform_indices = @transform_6, window_bounds = array<i64: 1, 8, 2>}]} {
    %c0 = arith.constant 0 : index
    %c0_0 = arith.constant 0 : index
    %c0_1 = arith.constant 0 : index
    %c0_2 = arith.constant 0 : index
    %0 = vector.load %arg5[%c0, %c0_0, %c0_1, %c0_2] : memref<1x1x4x1024xf32, #tpu.memory_space<vmem>>, vector<1x1x4x1024xf32>
    %1 = vector.shape_cast %0 : vector<1x1x4x1024xf32> to vector<4x1024xf32>
    %c0_3 = arith.constant 0 : index
    %c0_4 = arith.constant 0 : index
    %c0_5 = arith.constant 0 : index
    %c0_6 = arith.constant 0 : index
    %2 = vector.load %arg6[%c0_3, %c0_4, %c0_5, %c0_6] : memref<1x1x4x256xf32, #tpu.memory_space<vmem>>, vector<1x1x4x256xf32>
    %3 = vector.shape_cast %2 : vector<1x1x4x256xf32> to vector<4x256xf32>
    %4 = tpu.concatenate %1, %3 in 1 : vector<4x1024xf32>, vector<4x256xf32> -> vector<4x1280xf32>
    %5 = vector.extract_strided_slice %4 {offsets = [0, 0], sizes = [4, 1024], strides = [1, 1]} : vector<4x1280xf32> to vector<4x1024xf32>
    %c0_7 = arith.constant 0 : index
    %c0_8 = arith.constant 0 : index
    %6 = vector.load %arg9[%c0_7, %c0_8] : memref<112x1024xf32, #tpu.memory_space<vmem>>, vector<4x1024xf32>
    tpu.vector_store %arg9[%c0_7, %c0_8], %5 {strides = array<i32>} : memref<112x1024xf32, #tpu.memory_space<vmem>>, vector<4x1024xf32>,
    %7 = vector.extract_strided_slice %4 {offsets = [0, 1], sizes = [4, 1024], strides = [1, 1]} : vector<4x1280xf32> to vector<4x1024xf32>
    %c4 = arith.constant 4 : index
    %c0_9 = arith.constant 0 : index
    %8 = vector.load %arg9[%c4, %c0_9] : memref<112x1024xf32, #tpu.memory_space<vmem>>, vector<4x1024xf32>
    tpu.vector_store %arg9[%c4, %c0_9], %7 {strides = array<i32>} : memref<112x1024xf32, #tpu.memory_space<vmem>>, vector<4x1024xf32>,
    %9 = vector.extract_strided_slice %4 {offsets = [0, 2], sizes = [4, 1024], strides = [1, 1]} : vector<4x1280xf32> to vector<4x1024xf32>
    %c8 = arith.constant 8 : index
    %c0_10 = arith.constant 0 : index
    %10 = vector.load %arg9[%c8, %c0_10] : memref<112x1024xf32, #tpu.memory_space<vmem>>, vector<4x1024xf32>
    tpu.vector_store %arg9[%c8, %c0_10], %9 {strides = array<i32>} : memref<112x1024xf32, #tpu.memory_space<vmem>>, vector<4x1024xf32>,
    %11 = vector.extract_strided_slice %4 {offsets = [0, 10], sizes = [4, 1024], strides = [1, 1]} : vector<4x1280xf32> to vector<4x1024xf32>
    %c12 = arith.constant 12 : index
    %c0_11 = arith.constant 0 : index
    %12 = vector.load %arg9[%c12, %c0_11] : memref<112x1024xf32, #tpu.memory_space<vmem>>, vector<4x1024xf32>
    tpu.vector_store %arg9[%c12, %c0_11], %11 {strides = array<i32>} : memref<112x1024xf32, #tpu.memory_space<vmem>>, vector<4x1024xf32>,
    %13 = vector.extract_strided_slice %4 {offsets = [0, 11], sizes = [4, 1024], strides = [1, 1]} : vector<4x1280xf32> to vector<4x1024xf32>
    %c16 = arith.constant 16 : index
    %c0_12 = arith.constant 0 : index
    %14 = vector.load %arg9[%c16, %c0_12] : memref<112x1024xf32, #tpu.memory_space<vmem>>, vector<4x1024xf32>
    tpu.vector_store %arg9[%c16, %c0_12], %13 {strides = array<i32>} : memref<112x1024xf32, #tpu.memory_space<vmem>>, vector<4x1024xf32>,
    %15 = vector.extract_strided_slice %4 {offsets = [0, 12], sizes = [4, 1024], strides = [1, 1]} : vector<4x1280xf32> to vector<4x1024xf32>
    %c20 = arith.constant 20 : index
    %c0_13 = arith.constant 0 : index
    %16 = vector.load %arg9[%c20, %c0_13] : memref<112x1024xf32, #tpu.memory_space<vmem>>, vector<4x1024xf32>
    tpu.vector_store %arg9[%c20, %c0_13], %15 {strides = array<i32>} : memref<112x1024xf32, #tpu.memory_space<vmem>>, vector<4x1024xf32>,
    %17 = vector.extract_strided_slice %4 {offsets = [0, 20], sizes = [4, 1024], strides = [1, 1]} : vector<4x1280xf32> to vector<4x1024xf32>
    %c24 = arith.constant 24 : index
    %c0_14 = arith.constant 0 : index
    %18 = vector.load %arg9[%c24, %c0_14] : memref<112x1024xf32, #tpu.memory_space<vmem>>, vector<4x1024xf32>
    tpu.vector_store %arg9[%c24, %c0_14], %17 {strides = array<i32>} : memref<112x1024xf32, #tpu.memory_space<vmem>>, vector<4x1024xf32>,
    %19 = vector.extract_strided_slice %4 {offsets = [0, 21], sizes = [4, 1024], strides = [1, 1]} : vector<4x1280xf32> to vector<4x1024xf32>
    %c28 = arith.constant 28 : index
    %c0_15 = arith.constant 0 : index
    %20 = vector.load %arg9[%c28, %c0_15] : memref<112x1024xf32, #tpu.memory_space<vmem>>, vector<4x1024xf32>
    tpu.vector_store %arg9[%c28, %c0_15], %19 {strides = array<i32>} : memref<112x1024xf32, #tpu.memory_space<vmem>>, vector<4x1024xf32>,
    %21 = vector.extract_strided_slice %4 {offsets = [0, 22], sizes = [4, 1024], strides = [1, 1]} : vector<4x1280xf32> to vector<4x1024xf32>
    %c32 = arith.constant 32 : index
    %c0_16 = arith.constant 0 : index
    %22 = vector.load %arg9[%c32, %c0_16] : memref<112x1024xf32, #tpu.memory_space<vmem>>, vector<4x1024xf32>
    tpu.vector_store %arg9[%c32, %c0_16], %21 {strides = array<i32>} : memref<112x1024xf32, #tpu.memory_space<vmem>>, vector<4x1024xf32>,
    %23 = vector.extract_strided_slice %4 {offsets = [0, 100], sizes = [4, 1024], strides = [1, 1]} : vector<4x1280xf32> to vector<4x1024xf32>
    %c36 = arith.constant 36 : index
    %c0_17 = arith.constant 0 : index
    %24 = vector.load %arg9[%c36, %c0_17] : memref<112x1024xf32, #tpu.memory_space<vmem>>, vector<4x1024xf32>
    tpu.vector_store %arg9[%c36, %c0_17], %23 {strides = array<i32>} : memref<112x1024xf32, #tpu.memory_space<vmem>>, vector<4x1024xf32>,
    %25 = vector.extract_strided_slice %4 {offsets = [0, 101], sizes = [4, 1024], strides = [1, 1]} : vector<4x1280xf32> to vector<4x1024xf32>
    %c40 = arith.constant 40 : index
    %c0_18 = arith.constant 0 : index
    %26 = vector.load %arg9[%c40, %c0_18] : memref<112x1024xf32, #tpu.memory_space<vmem>>, vector<4x1024xf32>
    tpu.vector_store %arg9[%c40, %c0_18], %25 {strides = array<i32>} : memref<112x1024xf32, #tpu.memory_space<vmem>>, vector<4x1024xf32>,
    %27 = vector.extract_strided_slice %4 {offsets = [0, 102], sizes = [4, 1024], strides = [1, 1]} : vector<4x1280xf32> to vector<4x1024xf32>
    %c44 = arith.constant 44 : index
    %c0_19 = arith.constant 0 : index
    %28 = vector.load %arg9[%c44, %c0_19] : memref<112x1024xf32, #tpu.memory_space<vmem>>, vector<4x1024xf32>
    tpu.vector_store %arg9[%c44, %c0_19], %27 {strides = array<i32>} : memref<112x1024xf32, #tpu.memory_space<vmem>>, vector<4x1024xf32>,
    %29 = vector.extract_strided_slice %4 {offsets = [0, 110], sizes = [4, 1024], strides = [1, 1]} : vector<4x1280xf32> to vector<4x1024xf32>
    %c48 = arith.constant 48 : index
    %c0_20 = arith.constant 0 : index
    %30 = vector.load %arg9[%c48, %c0_20] : memref<112x1024xf32, #tpu.memory_space<vmem>>, vector<4x1024xf32>
    tpu.vector_store %arg9[%c48, %c0_20], %29 {strides = array<i32>} : memref<112x1024xf32, #tpu.memory_space<vmem>>, vector<4x1024xf32>,
    %31 = vector.extract_strided_slice %4 {offsets = [0, 111], sizes = [4, 1024], strides = [1, 1]} : vector<4x1280xf32> to vector<4x1024xf32>
    %c52 = arith.constant 52 : index
    %c0_21 = arith.constant 0 : index
    %32 = vector.load %arg9[%c52, %c0_21] : memref<112x1024xf32, #tpu.memory_space<vmem>>, vector<4x1024xf32>
    tpu.vector_store %arg9[%c52, %c0_21], %31 {strides = array<i32>} : memref<112x1024xf32, #tpu.memory_space<vmem>>, vector<4x1024xf32>,
    %33 = vector.extract_strided_slice %4 {offsets = [0, 112], sizes = [4, 1024], strides = [1, 1]} : vector<4x1280xf32> to vector<4x1024xf32>
    %c56 = arith.constant 56 : index
    %c0_22 = arith.constant 0 : index
    %34 = vector.load %arg9[%c56, %c0_22] : memref<112x1024xf32, #tpu.memory_space<vmem>>, vector<4x1024xf32>
    tpu.vector_store %arg9[%c56, %c0_22], %33 {strides = array<i32>} : memref<112x1024xf32, #tpu.memory_space<vmem>>, vector<4x1024xf32>,
    %35 = vector.extract_strided_slice %4 {offsets = [0, 120], sizes = [4, 1024], strides = [1, 1]} : vector<4x1280xf32> to vector<4x1024xf32>
    %c60 = arith.constant 60 : index
    %c0_23 = arith.constant 0 : index
    %36 = vector.load %arg9[%c60, %c0_23] : memref<112x1024xf32, #tpu.memory_space<vmem>>, vector<4x1024xf32>
    tpu.vector_store %arg9[%c60, %c0_23], %35 {strides = array<i32>} : memref<112x1024xf32, #tpu.memory_space<vmem>>, vector<4x1024xf32>,
    %37 = vector.extract_strided_slice %4 {offsets = [0, 121], sizes = [4, 1024], strides = [1, 1]} : vector<4x1280xf32> to vector<4x1024xf32>
    %c64 = arith.constant 64 : index
    %c0_24 = arith.constant 0 : index
    %38 = vector.load %arg9[%c64, %c0_24] : memref<112x1024xf32, #tpu.memory_space<vmem>>, vector<4x1024xf32>
    tpu.vector_store %arg9[%c64, %c0_24], %37 {strides = array<i32>} : memref<112x1024xf32, #tpu.memory_space<vmem>>, vector<4x1024xf32>,
    %39 = vector.extract_strided_slice %4 {offsets = [0, 122], sizes = [4, 1024], strides = [1, 1]} : vector<4x1280xf32> to vector<4x1024xf32>
    %c68 = arith.constant 68 : index
    %c0_25 = arith.constant 0 : index
    %40 = vector.load %arg9[%c68, %c0_25] : memref<112x1024xf32, #tpu.memory_space<vmem>>, vector<4x1024xf32>
    tpu.vector_store %arg9[%c68, %c0_25], %39 {strides = array<i32>} : memref<112x1024xf32, #tpu.memory_space<vmem>>, vector<4x1024xf32>,
    %41 = vector.extract_strided_slice %4 {offsets = [0, 200], sizes = [4, 1024], strides = [1, 1]} : vector<4x1280xf32> to vector<4x1024xf32>
    %c72 = arith.constant 72 : index
    %c0_26 = arith.constant 0 : index
    %42 = vector.load %arg9[%c72, %c0_26] : memref<112x1024xf32, #tpu.memory_space<vmem>>, vector<4x1024xf32>
    tpu.vector_store %arg9[%c72, %c0_26], %41 {strides = array<i32>} : memref<112x1024xf32, #tpu.memory_space<vmem>>, vector<4x1024xf32>,
    %43 = vector.extract_strided_slice %4 {offsets = [0, 201], sizes = [4, 1024], strides = [1, 1]} : vector<4x1280xf32> to vector<4x1024xf32>
    %c76 = arith.constant 76 : index
    %c0_27 = arith.constant 0 : index
    %44 = vector.load %arg9[%c76, %c0_27] : memref<112x1024xf32, #tpu.memory_space<vmem>>, vector<4x1024xf32>
    tpu.vector_store %arg9[%c76, %c0_27], %43 {strides = array<i32>} : memref<112x1024xf32, #tpu.memory_space<vmem>>, vector<4x1024xf32>,
    %45 = vector.extract_strided_slice %4 {offsets = [0, 202], sizes = [4, 1024], strides = [1, 1]} : vector<4x1280xf32> to vector<4x1024xf32>
    %c80 = arith.constant 80 : index
    %c0_28 = arith.constant 0 : index
    %46 = vector.load %arg9[%c80, %c0_28] : memref<112x1024xf32, #tpu.memory_space<vmem>>, vector<4x1024xf32>
    tpu.vector_store %arg9[%c80, %c0_28], %45 {strides = array<i32>} : memref<112x1024xf32, #tpu.memory_space<vmem>>, vector<4x1024xf32>,
    %47 = vector.extract_strided_slice %4 {offsets = [0, 210], sizes = [4, 1024], strides = [1, 1]} : vector<4x1280xf32> to vector<4x1024xf32>
    %c84 = arith.constant 84 : index
    %c0_29 = arith.constant 0 : index
    %48 = vector.load %arg9[%c84, %c0_29] : memref<112x1024xf32, #tpu.memory_space<vmem>>, vector<4x1024xf32>
    tpu.vector_store %arg9[%c84, %c0_29], %47 {strides = array<i32>} : memref<112x1024xf32, #tpu.memory_space<vmem>>, vector<4x1024xf32>,
    %49 = vector.extract_strided_slice %4 {offsets = [0, 211], sizes = [4, 1024], strides = [1, 1]} : vector<4x1280xf32> to vector<4x1024xf32>
    %c88 = arith.constant 88 : index
    %c0_30 = arith.constant 0 : index
    %50 = vector.load %arg9[%c88, %c0_30] : memref<112x1024xf32, #tpu.memory_space<vmem>>, vector<4x1024xf32>
    tpu.vector_store %arg9[%c88, %c0_30], %49 {strides = array<i32>} : memref<112x1024xf32, #tpu.memory_space<vmem>>, vector<4x1024xf32>,
    %51 = vector.extract_strided_slice %4 {offsets = [0, 212], sizes = [4, 1024], strides = [1, 1]} : vector<4x1280xf32> to vector<4x1024xf32>
    %c92 = arith.constant 92 : index
    %c0_31 = arith.constant 0 : index
    %52 = vector.load %arg9[%c92, %c0_31] : memref<112x1024xf32, #tpu.memory_space<vmem>>, vector<4x1024xf32>
    tpu.vector_store %arg9[%c92, %c0_31], %51 {strides = array<i32>} : memref<112x1024xf32, #tpu.memory_space<vmem>>, vector<4x1024xf32>,
    %53 = vector.extract_strided_slice %4 {offsets = [0, 220], sizes = [4, 1024], strides = [1, 1]} : vector<4x1280xf32> to vector<4x1024xf32>
    %c96 = arith.constant 96 : index
    %c0_32 = arith.constant 0 : index
    %54 = vector.load %arg9[%c96, %c0_32] : memref<112x1024xf32, #tpu.memory_space<vmem>>, vector<4x1024xf32>
    tpu.vector_store %arg9[%c96, %c0_32], %53 {strides = array<i32>} : memref<112x1024xf32, #tpu.memory_space<vmem>>, vector<4x1024xf32>,
    %55 = vector.extract_strided_slice %4 {offsets = [0, 221], sizes = [4, 1024], strides = [1, 1]} : vector<4x1280xf32> to vector<4x1024xf32>
    %c100 = arith.constant 100 : index
    %c0_33 = arith.constant 0 : index
    %56 = vector.load %arg9[%c100, %c0_33] : memref<112x1024xf32, #tpu.memory_space<vmem>>, vector<4x1024xf32>
    tpu.vector_store %arg9[%c100, %c0_33], %55 {strides = array<i32>} : memref<112x1024xf32, #tpu.memory_space<vmem>>, vector<4x1024xf32>,
    %57 = vector.extract_strided_slice %4 {offsets = [0, 222], sizes = [4, 1024], strides = [1, 1]} : vector<4x1280xf32> to vector<4x1024xf32>
    %c104 = arith.constant 104 : index
    %c0_34 = arith.constant 0 : index
    %58 = vector.load %arg9[%c104, %c0_34] : memref<112x1024xf32, #tpu.memory_space<vmem>>, vector<4x1024xf32>
    tpu.vector_store %arg9[%c104, %c0_34], %57 {strides = array<i32>} : memref<112x1024xf32, #tpu.memory_space<vmem>>, vector<4x1024xf32>,
    %cst = arith.constant 0.000000e+00 : f32
    %59 = vector.broadcast %cst : f32 to vector<4x1024xf32>
    %c108 = arith.constant 108 : index
    %c0_35 = arith.constant 0 : index
    %60 = vector.load %arg9[%c108, %c0_35] : memref<112x1024xf32, #tpu.memory_space<vmem>>, vector<4x1024xf32>
    tpu.vector_store %arg9[%c108, %c0_35], %59 {strides = array<i32>} : memref<112x1024xf32, #tpu.memory_space<vmem>>, vector<4x1024xf32>,
    %c0_36 = arith.constant 0 : index
    %c0_37 = arith.constant 0 : index
    %61 = vector.load %arg2[%c0_36, %c0_37] : memref<8x112xf32, #tpu.memory_space<vmem>>, vector<8x112xf32>
    %c0_38 = arith.constant 0 : index
    %c0_39 = arith.constant 0 : index
    %62 = vector.load %arg9[%c0_38, %c0_39] : memref<112x1024xf32, #tpu.memory_space<vmem>>, vector<112x1024xf32>
    %cst_40 = arith.constant dense<0.000000e+00> : vector<8x1024xf32>
    %63 = tpu.matmul %61, %62, %cst_40 {dimension_numbers = #tpu.dot_dimension_numbers<[1], [0], [0], [1], [0, 0, 1, 1], [], []>} : vector<8x112xf32>, vector<112x1024xf32>, vector<8x1024xf32> -> vector<8x1024xf32>
    %c0_41 = arith.constant 0 : index
    %c0_42 = arith.constant 0 : index
    %64 = vector.load %arg3[%c0_41, %c0_42] : memref<8x1xf32, #tpu.memory_space<vmem>>, vector<8x1xf32>
    %65 = vector.broadcast %64 : vector<8x1xf32> to vector<8x1024xf32>
    %66 = arith.addf %63, %65 : vector<8x1024xf32>
    %cst_43 = arith.constant 0.000000e+00 : f32
    %67 = vector.broadcast %cst_43 : f32 to vector<8x1024xf32>
    %68 = arith.maximumf %66, %67 : vector<8x1024xf32>
    %c0_44 = arith.constant 0 : index
    %c0_45 = arith.constant 0 : index
    %c0_46 = arith.constant 0 : index
    %69 = vector.load %arg7[%c0_44, %c0_45, %c0_46] : memref<1x8x1024xf32, #tpu.memory_space<vmem>>, vector<1x8x1024xf32>
    %70 = vector.shape_cast %69 : vector<1x8x1024xf32> to vector<8x1024xf32>
    %71 = vector.shape_cast %68 : vector<8x1024xf32> to vector<1x8x1024xf32>
    tpu.vector_store %arg7[%c0_44, %c0_45, %c0_46], %71 {strides = array<i32>} : memref<1x8x1024xf32, #tpu.memory_space<vmem>>, vector<1x8x1024xf32>,
    %c0_47 = arith.constant 0 : index
    %c0_48 = arith.constant 0 : index
    %72 = vector.load %arg4[%c0_47, %c0_48] : memref<1x1024xf32, #tpu.memory_space<vmem>>, vector<1x1024xf32>
    %73 = vector.broadcast %72 : vector<1x1024xf32> to vector<8x1024xf32>
    %74 = arith.mulf %68, %73 : vector<8x1024xf32>
    %cst_49 = arith.constant dense<0.000000e+00> : vector<8xf32>
    %75 = vector.multi_reduction <add>, %74, %cst_49 [1] : vector<8x1024xf32> to vector<8xf32>
    %76 = vector.shape_cast %75 : vector<8xf32> to vector<8x1xf32>
    %77 = arith.mulf %74, %68 : vector<8x1024xf32>
    %cst_50 = arith.constant dense<0.000000e+00> : vector<8xf32>
    %78 = vector.multi_reduction <add>, %77, %cst_50 [1] : vector<8x1024xf32> to vector<8xf32>
    %79 = vector.shape_cast %78 : vector<8xf32> to vector<8x1xf32>
    %80 = tpu.concatenate %76, %79 in 1 : vector<8x1xf32>, vector<8x1xf32> -> vector<8x2xf32>
    %c0_i32 = arith.constant 0 : i32
    %81 = arith.cmpi eq, %arg1, %c0_i32 : i32
    %82 = arith.extui %81 : i1 to i32
    %c0_i32_51 = arith.constant 0 : i32
    %83 = arith.cmpi ne, %82, %c0_i32_51 : i32
    scf.if %83 {
      %cst_58 = arith.constant 0.000000e+00 : f32
      %90 = vector.broadcast %cst_58 : f32 to vector<8x2xf32>
      %c0_59 = arith.constant 0 : index
      %c0_60 = arith.constant 0 : index
      %c0_61 = arith.constant 0 : index
      %91 = vector.load %arg8[%c0_59, %c0_60, %c0_61] : memref<1x8x2xf32, #tpu.memory_space<vmem>>, vector<1x8x2xf32>
      %92 = vector.shape_cast %91 : vector<1x8x2xf32> to vector<8x2xf32>
      %93 = vector.shape_cast %90 : vector<8x2xf32> to vector<1x8x2xf32>
      tpu.vector_store %arg8[%c0_59, %c0_60, %c0_61], %93 {strides = array<i32>} : memref<1x8x2xf32, #tpu.memory_space<vmem>>, vector<1x8x2xf32>,
    } else {
    }
    %c0_52 = arith.constant 0 : index
    %c0_53 = arith.constant 0 : index
    %c0_54 = arith.constant 0 : index
    %84 = vector.load %arg8[%c0_52, %c0_53, %c0_54] : memref<1x8x2xf32, #tpu.memory_space<vmem>>, vector<1x8x2xf32>
    %85 = vector.shape_cast %84 : vector<1x8x2xf32> to vector<8x2xf32>
    %86 = arith.addf %85, %80 : vector<8x2xf32>
    %c0_55 = arith.constant 0 : index
    %c0_56 = arith.constant 0 : index
    %c0_57 = arith.constant 0 : index
    %87 = vector.load %arg8[%c0_55, %c0_56, %c0_57] : memref<1x8x2xf32, #tpu.memory_space<vmem>>, vector<1x8x2xf32>
    %88 = vector.shape_cast %87 : vector<1x8x2xf32> to vector<8x2xf32>
    %89 = vector.shape_cast %86 : vector<8x2xf32> to vector<1x8x2xf32>
    tpu.vector_store %arg8[%c0_55, %c0_56, %c0_57], %89 {strides = array<i32>} : memref<1x8x2xf32, #tpu.memory_space<vmem>>, vector<1x8x2xf32>,
    return
  }
  func.func @transform_0(%arg0: i32, %arg1: i32) -> (i32, i32) {
    %c0_i32 = arith.constant 0 : i32
    %c0_i32_0 = arith.constant 0 : i32
    %c0_i32_1 = arith.constant 0 : i32
    return %c0_i32, %c0_i32_0 : i32, i32
  }
  func.func @transform_1(%arg0: i32, %arg1: i32) -> (i32, i32) {
    %c0_i32 = arith.constant 0 : i32
    %c0_i32_0 = arith.constant 0 : i32
    %c0_i32_1 = arith.constant 0 : i32
    return %c0_i32, %c0_i32_0 : i32, i32
  }
  func.func @transform_2(%arg0: i32, %arg1: i32) -> (i32, i32) {
    %c0_i32 = arith.constant 0 : i32
    %c0_i32_0 = arith.constant 0 : i32
    return %c0_i32, %arg1 : i32, i32
  }
  func.func @transform_3(%arg0: i32, %arg1: i32) -> (i32, i32, i32, i32) {
    %c0_i32 = arith.constant 0 : i32
    %c0_i32_0 = arith.constant 0 : i32
    %c0_i32_1 = arith.constant 0 : i32
    return %c0_i32, %arg0, %c0_i32_0, %arg1 : i32, i32, i32, i32
  }
  func.func @transform_4(%arg0: i32, %arg1: i32) -> (i32, i32, i32, i32) {
    %c1_i32 = arith.constant 1 : i32
    %0 = arith.addi %arg1, %c1_i32 : i32
    %c4_i32 = arith.constant 4 : i32
    %1 = arith.muli %0, %c4_i32 : i32
    %c0_i32 = arith.constant 0 : i32
    %c0_i32_0 = arith.constant 0 : i32
    %c0_i32_1 = arith.constant 0 : i32
    return %c0_i32, %arg0, %c0_i32_0, %1 : i32, i32, i32, i32
  }
  func.func @transform_5(%arg0: i32, %arg1: i32) -> (i32, i32, i32) {
    %c0_i32 = arith.constant 0 : i32
    %c0_i32_0 = arith.constant 0 : i32
    return %arg0, %c0_i32, %arg1 : i32, i32, i32
  }
  func.func @transform_6(%arg0: i32, %arg1: i32) -> (i32, i32, i32) {
    %c0_i32 = arith.constant 0 : i32
    %c0_i32_0 = arith.constant 0 : i32
    %c0_i32_1 = arith.constant 0 : i32
    return %arg0, %c0_i32, %c0_i32_0 : i32, i32, i32
  }
}

</mosaic_0001>

<bundles_post_ra>
// kernel: crb3d_forward.1
= control target key start
LH: loop header
LB: loop body
LE: loop exit
PB: predicated region body
PF: predicated region fallthrough
CT: control target
= control target key end

     0   :  { %s2475_s21 = smov 0   ;;  %s2477_s22 = smov 0   ;;  %s3411_s0 = inlined_call_operand.vmem [shape: f32[8,112], index: 0, kind: input, shape index: {}]   ;;  %s3412_s1 = inlined_call_operand.vmem [shape: f32[8,1], index: 1, kind: input, shape index: {}]   ;;  %s3413_s2 = inlined_call_operand.vmem [shape: f32[1,2048], index: 2, kind: input, shape index: {}]   ;;  %s3414_s3 = inlined_call_operand.vmem [shape: f32[1,2,4,2048], index: 3, kind: input, shape index: {}, may-alias: {3,4}]   ;;  %s3415_s4 = inlined_call_operand.vmem [shape: f32[1,2,4,2048], index: 4, kind: input, shape index: {}, may-alias: {3,4}]   ;;  %s3416_s5 = inlined_call_operand.vmem [shape: f32[2,8,1024], index: 5, kind: output, shape index: {0}]   ;;  %s3417_s6 = inlined_call_operand.vmem [shape: f32[2,8,2], index: 6, kind: output, shape index: {1}]  }
   0x1   :  { %s2479_s23 = smov 0  }
   0x2 LB: > { %s29_s24 = sadd.s32 1, %s2406_s22  ;;  %p2198_p0 = scmp.ge.s32.totalorder %s2410_s23, 1  ;;  %s2410_s23 = sphi %s2479_s23, %s17_s23   ;;  %s2406_s22 = sphi %s2477_s22, %s3474_s22   ;;  %s2402_s21 = sphi %s2475_s21, %s3473_s21  }
   0x3   : > { %p31_p1 = scmp.ge.s32.totalorder %s29_s24, 2  ;;  %p271_p2 = scmp.lt.s32.totalorder %s2410_s23, 3 }
   0x5   : > { %s3476_s24 = smov (%p31_p1, %s29_s24), 0  ;;  %p272_p3 = pnand %p2198_p0, %p271_p2 }
   0x6   : > { %p334_p4 = scmp.lt.s32.totalorder (!%p272_p3), %s2402_s21, 1  ;;  %s2412_s29 = smov (!%p272_p3), 127   ;;  %vm425_vm0 = vcmask (!%p272_p3), 1039360   ;;  %vm468_vm1 = vcmask (!%p272_p3), 1031168   ;;  %vm511_vm2 = vcmask (!%p272_p3), 965632   ;;  %vm554_vm3 = vcmask (!%p272_p3), 957440  }
   0x7   : > { %275 = sbr.rel (%p272_p3) target bundleno = 985 (0x3d9), region = 40  ;;  %s2413_s10 = smov (!%p272_p3), 126   ;;  %vm597_vm4 = vcmask (!%p272_p3), 949248   ;;  %vm640_vm5 = vcmask (!%p272_p3), 883712   ;;  %vm683_vm6 = vcmask (!%p272_p3), 875520   ;;  %vm726_vm7 = vcmask (!%p272_p3), 867328  }
   0x8   : > { %s2414_s11 = smov (!%p272_p3), 118   ;;  %s2415_s12 = smov (!%p272_p3), 117   ;;  %vm769_vm8 = vcmask (!%p272_p3), 228352   ;;  %vm812_vm9 = vcmask (!%p272_p3), 220160   ;;  %vm855_vm10 = vcmask (!%p272_p3), 211968   ;;  %vm898_vm11 = vcmask (!%p272_p3), 146432  }
   0x9   : > { %s2416_s13 = smov (!%p272_p3), 116   ;;  %s2417_s14 = smov (!%p272_p3), 108   ;;  %vm941_vm12 = vcmask (!%p272_p3), 138240   ;;  %vm984_vm13 = vcmask (!%p272_p3), 130048   ;;  %vm1027_vm14 = vcmask (!%p272_p3), 64512   ;;  %vm3431_vm15 = vcmask (!%p272_p3), 56320  }
   0xa   : > { %s2418_s15 = smov (!%p272_p3), 107   ;;  %s2419_s16 = smov (!%p272_p3), 106  }
   0xb   : > { %s2420_s17 = smov (!%p272_p3), 28   ;;  %s2421_s18 = smov (!%p272_p3), 27  }
   0xc   : > { %s2422_s19 = smov (!%p272_p3), 26   ;;  %s2423_s20 = smov (!%p272_p3), 18  }
   0xd   : > { %s2424_s26 = smov (!%p272_p3), 17   ;;  %s2425_s27 = smov (!%p272_p3), 16  }
   0xe   : > { %s3478_s21 = smov (!%p334_p4, %s2402_s21), 1  ;;  %s3420_s7 = smov 56  }
   0xf   : > { %s2496_s25 = sshll.u32 %s3478_s21, 6  ;;  %s3418_s8 = smov 55  }
  0x10   : > { %s341_s28 = scalar_lea.vmem %s3414_s3, %s2496_s25  ;;  %s2214_s30 = sadd.s32 32, %s2496_s25 }
  0x11   : > { %v2502_v0 = vld [vmem:[%s341_s28 + $0x8] sm:$0xff]  ;;  %v2504_v1 = vld [vmem:[%s341_s28 + $0x10] sm:$0xff]  ;;  %v2506_v2 = vld [vmem:[%s341_s28 + $0x18] sm:$0xff]  ;;  %s2551_s9 = scalar_lea.vmem %s3415_s4, %s2214_s30  ;;  %s2428_s30 = smov 6  }
  0x12   : > { %v2510_v3 = vcombine.high %v2504_v1, %v2504_v1  ;;  %v2514_v4 = vcombine.high %v2506_v2, %v2506_v2  ;;  %v2517_v5 = vrot.slane %v2502_v0, 4  ;;  %v2521_v6 = vcombine.high %v2502_v0, %v2502_v0  ;;  %392 = vst [vmem:[#allocation2 + $0x10] sm:$0xf] %v2502_v0  ;;  %394 = vst [vmem:[#allocation2 + $0x20] sm:$0xf] %v2504_v1  ;;  %v2526_v7 = vld [vmem:[%s341_s28] sm:$0xff] }
  0x13   : > { %396 = vst [vmem:[#allocation2 + $0x30] sm:$0xf] %v2506_v2  ;;  %v2529_v8 = vrot.slane %v2526_v7, 4  ;;  %v2533_v9 = vcombine.high %v2526_v7, %v2526_v7  ;;  %390 = vst [vmem:[#allocation2] sm:$0xf] %v2526_v7  ;;  %v2546_v10 = vrot.slane %v2504_v1, 4 }
  0x14   : > { %411 = vrot.lane.b32.xlu1 %v2517_v5, %s2412_s29  ;;  %393 = vst [vmem:[#allocation2 + $0x18] sm:$0xf] %v2521_v6  ;;  %395 = vst [vmem:[#allocation2 + $0x28] sm:$0xf] %v2510_v3  ;;  %v2556_v11 = vrot.slane %v2506_v2, 4  ;;  %v2559_v12 = vld [vmem:[%s2551_s9] sm:$0xff] }
  0x15   : > { %397 = vst [vmem:[#allocation2 + $0x38] sm:$0xf] %v2514_v4  ;;  %407 = vrot.lane.b32.xlu0 %v2529_v8, %s2412_s29  ;;  %391 = vst [vmem:[#allocation2 + $0x8] sm:$0xf] %v2533_v9  ;;  %v2564_v13 = vrot.slane %v2559_v12, 4  ;;  %s2426_s28 = smov 8  }
  0x18   : > { %413 = vrot.lane.b32.xlu1 %v2521_v6, %s2412_s29 }
  0x19   : > { %409 = vrot.lane.b32.xlu0 %v2533_v9, %s2412_s29 }
  0x1c   : > { %417 = vrot.lane.b32.xlu1 %v2510_v3, %s2412_s29 }
  0x1d   : > { %415 = vrot.lane.b32.xlu0 %v2546_v10, %s2412_s29 }
  0x20   : > { %421 = vrot.lane.b32.xlu1 %v2514_v4, %s2412_s29 }
  0x21   : > { %419 = vrot.lane.b32.xlu0 %v2556_v11, %s2412_s29 }
  0x24   : > { %450 = vrot.lane.b32.xlu1 %v2526_v7, %s2413_s10 }
  0x25   : > { %423 = vrot.lane.b32.xlu0 %v2564_v13, %s2412_s29  ;;  %s2427_s29 = smov 7  }
  0x28   : > { %454 = vrot.lane.b32.xlu1 %v2502_v0, %s2413_s10 }
  0x29   : > { %452 = vrot.lane.b32.xlu0 %v2533_v9, %s2413_s10 }
  0x2c   : > { %458 = vrot.lane.b32.xlu1 %v2504_v1, %s2413_s10 }
  0x2d   : > { %456 = vrot.lane.b32.xlu0 %v2521_v6, %s2413_s10 }
  0x30   : > { %462 = vrot.lane.b32.xlu1 %v2506_v2, %s2413_s10 }
  0x31   : > { %460 = vrot.lane.b32.xlu0 %v2510_v3, %s2413_s10 }
  0x34   : > { %466 = vrot.lane.b32.xlu1 %v2559_v12, %s2413_s10 }
  0x35   : > { %464 = vrot.lane.b32.xlu0 %v2514_v4, %s2413_s10  ;;  %s2431_s10 = smov 54  }
  0x38   : > { %495 = vrot.lane.b32.xlu1 %v2533_v9, %s2414_s11 }
  0x39   : > { %493 = vrot.lane.b32.xlu0 %v2529_v8, %s2414_s11 }
  0x3c   : > { %499 = vrot.lane.b32.xlu1 %v2521_v6, %s2414_s11 }
  0x3d   : > { %497 = vrot.lane.b32.xlu0 %v2517_v5, %s2414_s11 }
  0x40   : > { %503 = vrot.lane.b32.xlu1 %v2510_v3, %s2414_s11 }
  0x41   : > { %501 = vrot.lane.b32.xlu0 %v2546_v10, %s2414_s11 }
  0x44   : > { %507 = vrot.lane.b32.xlu1 %v2514_v4, %s2414_s11 }
  0x45   : > { %505 = vrot.lane.b32.xlu0 %v2556_v11, %s2414_s11 }
  0x48   : > { %536 = vrot.lane.b32.xlu1 %v2526_v7, %s2415_s12 }
  0x49   : > { %509 = vrot.lane.b32.xlu0 %v2564_v13, %s2414_s11  ;;  %s3426_s11 = smov 46  }
  0x4c   : > { %540 = vrot.lane.b32.xlu1 %v2502_v0, %s2415_s12 }
  0x4d   : > { %538 = vrot.lane.b32.xlu0 %v2533_v9, %s2415_s12 }
  0x50   : > { %544 = vrot.lane.b32.xlu1 %v2504_v1, %s2415_s12 }
  0x51   : > { %542 = vrot.lane.b32.xlu0 %v2521_v6, %s2415_s12 }
  0x54   : > { %581 = vrot.lane.b32.xlu1 %v2533_v9, %s2416_s13 }
  0x55   : > { %546 = vrot.lane.b32.xlu0 %v2510_v3, %s2415_s12 }
  0x58   : > { %624 = vrot.lane.b32.xlu1 %v2533_v9, %s2417_s14 }
  0x59   : > { %583 = vrot.lane.b32.xlu0 %v2517_v5, %s2416_s13 }
  0x5c   : > { %667 = vrot.lane.b32.xlu1 %v2533_v9, %s2418_s15 }
  0x5d   : > { %626 = vrot.lane.b32.xlu0 %v2502_v0, %s2417_s14 }
  0x60   : > { %579 = vrot.lane.b32.xlu1 %v2529_v8, %s2416_s13 }
  0x61   : > { %669 = vrot.lane.b32.xlu0 %v2517_v5, %s2418_s15 }
  0x64   : > { %665 = vrot.lane.b32.xlu1 %v2529_v8, %s2418_s15 }
  0x65   : > { %622 = vrot.lane.b32.xlu0 %v2526_v7, %s2417_s14 }
  0x68   : > { %587 = vrot.lane.b32.xlu1 %v2546_v10, %s2416_s13 }
  0x69   : > { %585 = vrot.lane.b32.xlu0 %v2521_v6, %s2416_s13 }
  0x6c   : > { %630 = vrot.lane.b32.xlu1 %v2504_v1, %s2417_s14 }
  0x6d   : > { %628 = vrot.lane.b32.xlu0 %v2521_v6, %s2417_s14 }
  0x70   : > { %673 = vrot.lane.b32.xlu1 %v2546_v10, %s2418_s15 }
  0x71   : > { %671 = vrot.lane.b32.xlu0 %v2521_v6, %s2418_s15 }
  0x74   : > { %712 = vrot.lane.b32.xlu1 %v2502_v0, %s2419_s16 }
  0x75   : > { %710 = vrot.lane.b32.xlu0 %v2533_v9, %s2419_s16 }
  0x78   : > { %755 = vrot.lane.b32.xlu1 %v2517_v5, %s2420_s17 }
  0x79   : > { %753 = vrot.lane.b32.xlu0 %v2533_v9, %s2420_s17 }
  0x7c   : > { %798 = vrot.lane.b32.xlu1 %v2502_v0, %s2421_s18 }
  0x7d   : > { %796 = vrot.lane.b32.xlu0 %v2533_v9, %s2421_s18 }
  0x80   : > { %841 = vrot.lane.b32.xlu1 %v2517_v5, %s2422_s19 }
  0x81   : > { %839 = vrot.lane.b32.xlu0 %v2533_v9, %s2422_s19 }
  0x84   : > { %751 = vrot.lane.b32.xlu1 %v2529_v8, %s2420_s17 }
  0x85   : > { %708 = vrot.lane.b32.xlu0 %v2526_v7, %s2419_s16 }
  0x86   : > { %v412_v14 = vpop.permute.xlu1 %411 }
  0x87   : > { %v408_v15 = vpop.permute.xlu0 %407 }
  0x88   : > { %837 = vrot.lane.b32.xlu1 %v2529_v8, %s2422_s19 }
  0x89   : > { %794 = vrot.lane.b32.xlu0 %v2526_v7, %s2421_s18 }
  0x8a   : > { %v414_v16 = vpop.permute.xlu1 %413 }
  0x8b   : > { %v428_v17 = vsel %vm425_vm0, %v412_v14, %v414_v16  ;;  %v410_v18 = vpop.permute.xlu0 %409 }
  0x8c   : > { %444 = vst [vmem:[#allocation2 + $0x10] sm:$0xf0] %v428_v17  ;;  %v426_v19 = vsel %vm425_vm0, %v408_v15, %v410_v18  ;;  %v427_v20 = vsel %vm425_vm0, %v410_v18, %v412_v14  ;;  %716 = vrot.lane.b32.xlu1 %v2504_v1, %s2419_s16 }
  0x8d   : > { %442 = vst [vmem:[#allocation2] sm:$0xf0] %v426_v19  ;;  %443 = vst [vmem:[#allocation2 + $0x8] sm:$0xf0] %v427_v20  ;;  %714 = vrot.lane.b32.xlu0 %v2521_v6, %s2419_s16 }
  0x8e   : > { %v418_v21 = vpop.permute.xlu1 %417 }
  0x8f   : > { %v416_v22 = vpop.permute.xlu0 %415 }
  0x90   : > { %v429_v23 = vsel %vm425_vm0, %v414_v16, %v416_v22  ;;  %v430_v24 = vsel %vm425_vm0, %v416_v22, %v418_v21  ;;  %759 = vrot.lane.b32.xlu1 %v2546_v10, %s2420_s17 }
  0x91   : > { %445 = vst [vmem:[#allocation2 + $0x18] sm:$0xf0] %v429_v23  ;;  %446 = vst [vmem:[#allocation2 + $0x20] sm:$0xf0] %v430_v24  ;;  %757 = vrot.lane.b32.xlu0 %v2521_v6, %s2420_s17 }
  0x92   : > { %v422_v25 = vpop.permute.xlu1 %421 }
  0x93   : > { %v420_v26 = vpop.permute.xlu0 %419 }
  0x94   : > { %v431_v27 = vsel %vm425_vm0, %v418_v21, %v420_v26  ;;  %v432_v28 = vsel %vm425_vm0, %v420_v26, %v422_v25  ;;  %802 = vrot.lane.b32.xlu1 %v2504_v1, %s2421_s18  ;;  %v1536_v14 = vld [vmem:[#allocation2 + $0x8] sm:$0xff]  ;;  %v1535_v17 = vld [vmem:[#allocation2] sm:$0xff]  ;;  %v1537_v26 = vld [vmem:[#allocation2 + $0x10] sm:$0xff] }
  0x95   : > { %447 = vst [vmem:[#allocation2 + $0x28] sm:$0xf0] %v431_v27  ;;  %448 = vst [vmem:[#allocation2 + $0x30] sm:$0xf0] %v432_v28  ;;  %800 = vrot.lane.b32.xlu0 %v2521_v6, %s2421_s18 }
  0x96   : > { %v451_v29 = vpop.permute.xlu1 %450 }
  0x97   : > { %v424_v30 = vpop.permute.xlu0 %423 }
  0x98   : > { %v433_v31 = vsel %vm425_vm0, %v422_v25, %v424_v30  ;;  %845 = vrot.lane.b32.xlu1 %v2546_v10, %s2422_s19  ;;  %v1538_v23 = vld [vmem:[#allocation2 + $0x18] sm:$0xff]  ;;  %vm3430_vm0 = vcmask 48128  }
  0x99   : > { %449 = vst [vmem:[#allocation2 + $0x38] sm:$0xf0] %v433_v31  ;;  %843 = vrot.lane.b32.xlu0 %v2521_v6, %s2422_s19 }
  0x9a   : > { %v455_v32 = vpop.permute.xlu1 %454 }
  0x9b   : > { %v453_v33 = vpop.permute.xlu0 %452 }
  0x9c   : > { %v469_v34 = vsel %vm468_vm1, %v451_v29, %v453_v33  ;;  %v470_v35 = vsel %vm468_vm1, %v453_v33, %v455_v32  ;;  %884 = vrot.lane.b32.xlu1 %v2502_v0, %s2423_s20 }
  0x9d   : > { %485 = vst [vmem:[#allocation2 + $0x40] sm:$0xf] %v469_v34  ;;  %486 = vst [vmem:[#allocation2 + $0x48] sm:$0xf] %v470_v35  ;;  %882 = vrot.lane.b32.xlu0 %v2533_v9, %s2423_s20 }
  0x9e   : > { %v459_v36 = vpop.permute.xlu1 %458 }
  0x9f   : > { %v457_v37 = vpop.permute.xlu0 %456 }
  0xa0   : > { %v471_v38 = vsel %vm468_vm1, %v455_v32, %v457_v37  ;;  %v472_v39 = vsel %vm468_vm1, %v457_v37, %v459_v36  ;;  %927 = vrot.lane.b32.xlu1 %v2517_v5, %s2424_s26 }
  0xa1   : > { %487 = vst [vmem:[#allocation2 + $0x50] sm:$0xf] %v471_v38  ;;  %488 = vst [vmem:[#allocation2 + $0x58] sm:$0xf] %v472_v39  ;;  %925 = vrot.lane.b32.xlu0 %v2533_v9, %s2424_s26 }
  0xa2   : > { %v463_v40 = vpop.permute.xlu1 %462 }
  0xa3   : > { %v461_v41 = vpop.permute.xlu0 %460 }
  0xa4   : > { %v473_v42 = vsel %vm468_vm1, %v459_v36, %v461_v41  ;;  %v474_v43 = vsel %vm468_vm1, %v461_v41, %v463_v40  ;;  %970 = vrot.lane.b32.xlu1 %v2502_v0, %s2425_s27 }
  0xa5   : > { %489 = vst [vmem:[#allocation2 + $0x60] sm:$0xf] %v473_v42  ;;  %490 = vst [vmem:[#allocation2 + $0x68] sm:$0xf] %v474_v43  ;;  %968 = vrot.lane.b32.xlu0 %v2533_v9, %s2425_s27 }
  0xa6   : > { %v467_v44 = vpop.permute.xlu1 %466 }
  0xa7   : > { %v465_v45 = vpop.permute.xlu0 %464 }
  0xa8   : > { %v475_v46 = vsel %vm468_vm1, %v463_v40, %v465_v45  ;;  %v476_v47 = vsel %vm468_vm1, %v465_v45, %v467_v44  ;;  %1013 = vrot.lane.b32.xlu1 %v2517_v5, %s2426_s28  ;;  %vm3428_vm1 = vcmask 457728  }
  0xa9   : > { %491 = vst [vmem:[#allocation2 + $0x70] sm:$0xf] %v475_v46  ;;  %492 = vst [vmem:[#allocation2 + $0x78] sm:$0xf] %v476_v47  ;;  %1011 = vrot.lane.b32.xlu0 %v2533_v9, %s2426_s28 }
  0xaa   : > { %v496_v48 = vpop.permute.xlu1 %495 }
  0xab   : > { %v494_v49 = vpop.permute.xlu0 %493 }
  0xac   : > { %v512_v50 = vsel %vm511_vm2, %v494_v49, %v496_v48  ;;  %923 = vrot.lane.b32.xlu1 %v2529_v8, %s2424_s26 }
  0xad   : > { %528 = vst [vmem:[#allocation2 + $0x40] sm:$0xf0] %v512_v50  ;;  %880 = vrot.lane.b32.xlu0 %v2526_v7, %s2423_s20 }
  0xae   : > { %v500_v51 = vpop.permute.xlu1 %499 }
  0xaf   : > { %v498_v52 = vpop.permute.xlu0 %497 }
  0xb0   : > { %v513_v53 = vsel %vm511_vm2, %v496_v48, %v498_v52  ;;  %v514_v54 = vsel %vm511_vm2, %v498_v52, %v500_v51  ;;  %1009 = vrot.lane.b32.xlu1 %v2529_v8, %s2426_s28 }
  0xb1   : > { %529 = vst [vmem:[#allocation2 + $0x48] sm:$0xf0] %v513_v53  ;;  %530 = vst [vmem:[#allocation2 + $0x50] sm:$0xf0] %v514_v54  ;;  %966 = vrot.lane.b32.xlu0 %v2526_v7, %s2425_s27 }
  0xb2   : > { %v504_v55 = vpop.permute.xlu1 %503 }
  0xb3   : > { %v502_v56 = vpop.permute.xlu0 %501 }
  0xb4   : > { %v515_v57 = vsel %vm511_vm2, %v500_v51, %v502_v56  ;;  %v516_v58 = vsel %vm511_vm2, %v502_v56, %v504_v55  ;;  %888 = vrot.lane.b32.xlu1 %v2504_v1, %s2423_s20  ;;  %v1543_v61 = vld [vmem:[#allocation2 + $0x40] sm:$0xff] }
  0xb5   : > { %531 = vst [vmem:[#allocation2 + $0x58] sm:$0xf0] %v515_v57  ;;  %532 = vst [vmem:[#allocation2 + $0x60] sm:$0xf0] %v516_v58  ;;  %886 = vrot.lane.b32.xlu0 %v2521_v6, %s2423_s20  ;;  %v2219_v19 = vpack.c.bf16 %v1543_v61, %v1535_v17 }
  0xb6   : > { %v508_v59 = vpop.permute.xlu1 %507 }
  0xb7   : > { %v506_v60 = vpop.permute.xlu0 %505 }
  0xb8   : > { %v517_v62 = vsel %vm511_vm2, %v504_v55, %v506_v60  ;;  %v518_v63 = vsel %vm511_vm2, %v506_v60, %v508_v59  ;;  %931 = vrot.lane.b32.xlu1 %v2546_v10, %s2424_s26  ;;  %v1544_v15 = vld [vmem:[#allocation2 + $0x48] sm:$0xff]  ;;  %v1545_v21 = vld [vmem:[#allocation2 + $0x50] sm:$0xff] }
  0xb9   : > { %533 = vst [vmem:[#allocation2 + $0x68] sm:$0xf0] %v517_v62  ;;  %534 = vst [vmem:[#allocation2 + $0x70] sm:$0xf0] %v518_v63  ;;  %929 = vrot.lane.b32.xlu0 %v2521_v6, %s2424_s26  ;;  %v2217_v16 = vpack.c.bf16 %v1544_v15, %v1536_v14  ;;  %v2247_v28 = vpack.c.bf16 %v1545_v21, %v1537_v26 }
  0xba   : > { %v537_v18 = vpop.permute.xlu1 %536 }
  0xbb   : > { %v510_v20 = vpop.permute.xlu0 %509  ;;  %2218 = vmatprep.subr.bf16.mxu0 %v2217_v16 }
  0xbc   : > { %v519_v22 = vsel %vm511_vm2, %v508_v59, %v510_v20  ;;  %2220 = vmatpush1.bf16.msra.mxu0 %v2219_v19  ;;  %974 = vrot.lane.b32.xlu1 %v2504_v1, %s2425_s27  ;;  %v1546_v24 = vld [vmem:[#allocation2 + $0x58] sm:$0xff]  ;;  %vm3429_vm2 = vcmask 449536  }
  0xbd   : > { %535 = vst [vmem:[#allocation2 + $0x78] sm:$0xf0] %v519_v22  ;;  %972 = vrot.lane.b32.xlu0 %v2521_v6, %s2425_s27  ;;  %v2245_v25 = vpack.c.bf16 %v1546_v24, %v1538_v23 }
  0xbe   : > { %v541_v27 = vpop.permute.xlu1 %540 }
  0xbf   : > { %2246 = vmatprep.subr.bf16.mxu1 %v2245_v25  ;;  %v539_v29 = vpop.permute.xlu0 %538 }
  0xc0   : > { %v555_v30 = vsel %vm554_vm3, %v537_v18, %v539_v29  ;;  %v556_v31 = vsel %vm554_vm3, %v539_v29, %v541_v27  ;;  %2248 = vmatpush1.bf16.msra.mxu1 %v2247_v28  ;;  %1017 = vrot.lane.b32.xlu1 %v2546_v10, %s2426_s28 }
  0xc1   : > { %571 = vst [vmem:[#allocation2 + $0x80] sm:$0xf] %v555_v30  ;;  %572 = vst [vmem:[#allocation2 + $0x88] sm:$0xf] %v556_v31  ;;  %1015 = vrot.lane.b32.xlu0 %v2521_v6, %s2426_s28 }
  0xc2   : > { %v545_v32 = vpop.permute.xlu1 %544 }
  0xc3   : > { %v543_v33 = vpop.permute.xlu0 %542 }
  0xc4   : > { %v557_v34 = vsel %vm554_vm3, %v541_v27, %v543_v33  ;;  %v558_v35 = vsel %vm554_vm3, %v543_v33, %v545_v32  ;;  %1056 = vrot.lane.b32.xlu1 %v2502_v0, %s2427_s29 }
  0xc5   : > { %573 = vst [vmem:[#allocation2 + $0x90] sm:$0xf] %v557_v34  ;;  %574 = vst [vmem:[#allocation2 + $0x98] sm:$0xf] %v558_v35  ;;  %1054 = vrot.lane.b32.xlu0 %v2533_v9, %s2427_s29 }
  0xc6   : > { %v582_v36 = vpop.permute.xlu1 %581 }
  0xc7   : > { %v2739_v37 = vpop.permute.xlu0 %546 }
  0xc8   : > { %v559_v38 = vsel %vm554_vm3, %v545_v32, %v2739_v37  ;;  %1099 = vrot.lane.b32.xlu1 %v2517_v5, %s2428_s30 }
  0xc9   : > { %575 = vst [vmem:[#allocation2 + $0xa0] sm:$0xf] %v559_v38  ;;  %1097 = vrot.lane.b32.xlu0 %v2533_v9, %s2428_s30 }
  0xca   : > { %v625_v39 = vpop.permute.xlu1 %624 }
  0xcb   : > { %v584_v40 = vpop.permute.xlu0 %583 }
  0xcc   : > { %v599_v41 = vsel %vm597_vm4, %v582_v36, %v584_v40  ;;  %1142 = vrot.lane.b32.xlu1 %v2521_v6, %s3420_s7 }
  0xcd   : > { %615 = vst [vmem:[#allocation2 + $0x88] sm:$0xf0] %v599_v41  ;;  %1140 = vrot.lane.b32.xlu0 %v2502_v0, %s3420_s7 }
  0xce   : > { %v668_v42 = vpop.permute.xlu1 %667 }
  0xcf   : > { %v627_v43 = vpop.permute.xlu0 %626 }
  0xd0   : > { %v642_v44 = vsel %vm640_vm5, %v625_v39, %v627_v43  ;;  %1186 = vrot.lane.b32.xlu1 %v2521_v6, %s3418_s8 }
  0xd1   : > { %658 = vst [vmem:[#allocation2 + $0xc8] sm:$0xf] %v642_v44  ;;  %1184 = vrot.lane.b32.xlu0 %v2517_v5, %s3418_s8 }
  0xd2   : > { %v580_v45 = vpop.permute.xlu1 %579 }
  0xd3   : > { %v598_v46 = vsel %vm597_vm4, %v580_v45, %v582_v36  ;;  %v670_v47 = vpop.permute.xlu0 %669 }
  0xd4   : > { %614 = vst [vmem:[#allocation2 + $0x80] sm:$0xf0] %v598_v46  ;;  %v685_v48 = vsel %vm683_vm6, %v668_v42, %v670_v47  ;;  %1095 = vrot.lane.b32.xlu1 %v2529_v8, %s2428_s30  ;;  %v1552_v55 = vld [vmem:[#allocation2 + $0x88] sm:$0xff] }
  0xd5   : > { %701 = vst [vmem:[#allocation2 + $0xc8] sm:$0xf0] %v685_v48  ;;  %1052 = vrot.lane.b32.xlu0 %v2526_v7, %s2427_s29 }
  0xd6   : > { %v666_v49 = vpop.permute.xlu1 %665 }
  0xd7   : > { %v684_v50 = vsel %vm683_vm6, %v666_v49, %v668_v42  ;;  %v623_v51 = vpop.permute.xlu0 %622 }
  0xd8   : > { %700 = vst [vmem:[#allocation2 + $0xc0] sm:$0xf0] %v684_v50  ;;  %v641_v52 = vsel %vm640_vm5, %v623_v51, %v625_v39  ;;  %1182 = vrot.lane.b32.xlu1 %v2533_v9, %s3418_s8 }
  0xd9   : > { %657 = vst [vmem:[#allocation2 + $0xc0] sm:$0xf] %v641_v52  ;;  %1138 = vrot.lane.b32.xlu0 %v2533_v9, %s3420_s7 }
  0xda   : > { %v2769_v53 = vpop.permute.xlu1 %587 }
  0xdb   : > { %v586_v8 = vpop.permute.xlu0 %585  ;;  %v1551_v62 = vld [vmem:[#allocation2 + $0x80] sm:$0xff] }
  0xdc   : > { %v600_v54 = vsel %vm597_vm4, %v584_v40, %v586_v8  ;;  %v601_v7 = vsel %vm597_vm4, %v586_v8, %v2769_v53  ;;  %1060 = vrot.lane.b32.xlu1 %v2504_v1, %s2427_s29  ;;  %v1560_v56 = vld [vmem:[#allocation2 + $0xc8] sm:$0xff] }
  0xdd   : > { %616 = vst [vmem:[#allocation2 + $0x90] sm:$0xf0] %v600_v54  ;;  %617 = vst [vmem:[#allocation2 + $0x98] sm:$0xf0] %v601_v7  ;;  %1058 = vrot.lane.b32.xlu0 %v2521_v6, %s2427_s29  ;;  %v2221_v57 = vpack.c.bf16 %v1560_v56, %v1552_v55 }
  0xde   : > { %v2778_v58 = vpop.permute.xlu1 %630 }
  0xdf   : > { %v629_v59 = vpop.permute.xlu0 %628  ;;  %2222 = vmatprep.subr.bf16.mxu0 %v2221_v57 }
  0xe0   : > { %v643_v60 = vsel %vm640_vm5, %v627_v43, %v629_v59  ;;  %v644_v61 = vsel %vm640_vm5, %v629_v59, %v2778_v58  ;;  %1103 = vrot.lane.b32.xlu1 %v2546_v10, %s2428_s30  ;;  %v1559_v63 = vld [vmem:[#allocation2 + $0xc0] sm:$0xff] }
  0xe1   : > { %659 = vst [vmem:[#allocation2 + $0xd0] sm:$0xf] %v643_v60  ;;  %660 = vst [vmem:[#allocation2 + $0xd8] sm:$0xf] %v644_v61  ;;  %1101 = vrot.lane.b32.xlu0 %v2521_v6, %s2428_s30  ;;  %v2223_v14 = vpack.c.bf16 %v1559_v63, %v1551_v62 }
  0xe2   : > { %v2787_v15 = vpop.permute.xlu1 %673 }
  0xe3   : > { %v672_v16 = vpop.permute.xlu0 %671  ;;  %2224 = vmatpush1.bf16.msra.mxu0 %v2223_v14 }
  0xe4   : > { %v686_v17 = vsel %vm683_vm6, %v670_v47, %v672_v16  ;;  %v687_v18 = vsel %vm683_vm6, %v672_v16, %v2787_v15  ;;  %1146 = vrot.lane.b32.xlu1 %v2510_v3, %s3420_s7  ;;  %v1554_v24 = vld [vmem:[#allocation2 + $0x98] sm:$0xff]  ;;  %v1553_v27 = vld [vmem:[#allocation2 + $0x90] sm:$0xff] }
  0xe5   : > { %702 = vst [vmem:[#allocation2 + $0xd0] sm:$0xf0] %v686_v17  ;;  %703 = vst [vmem:[#allocation2 + $0xd8] sm:$0xf0] %v687_v18  ;;  %1144 = vrot.lane.b32.xlu0 %v2504_v1, %s3420_s7  ;;  %s3422_s7 = smov 44  }
  0xe6   : > { %v713_v19 = vpop.permute.xlu1 %712 }
  0xe7   : > { %v711_v20 = vpop.permute.xlu0 %710 }
  0xe8   : > { %v728_v21 = vsel %vm726_vm7, %v711_v20, %v713_v19  ;;  %1190 = vrot.lane.b32.xlu1 %v2510_v3, %s3418_s8 }
  0xe9   : > { %744 = vst [vmem:[#allocation2 + $0x108] sm:$0xf] %v728_v21  ;;  %1188 = vrot.lane.b32.xlu0 %v2546_v10, %s3418_s8  ;;  %s3424_s8 = smov 45  }
  0xea   : > { %v2801_v22 = vpop.permute.xlu1 %755 }
  0xeb   : > { %v754_v23 = vpop.permute.xlu0 %753 }
  0xec   : > { %v771_v25 = vsel %vm769_vm8, %v754_v23, %v2801_v22  ;;  %1229 = vrot.lane.b32.xlu1 %v2521_v6, %s2431_s10  ;;  %v1562_v26 = vld [vmem:[#allocation2 + $0xd8] sm:$0xff]  ;;  %v1561_v28 = vld [vmem:[#allocation2 + $0xd0] sm:$0xff] }
  0xed   : > { %787 = vst [vmem:[#allocation2 + $0x108] sm:$0xf0] %v771_v25  ;;  %1227 = vrot.lane.b32.xlu0 %v2502_v0, %s2431_s10  ;;  %v2249_v29 = vpack.c.bf16 %v1562_v26, %v1554_v24  ;;  %v2251_v30 = vpack.c.bf16 %v1561_v28, %v1553_v27 }
  0xee   : > { %v799_v31 = vpop.permute.xlu1 %798 }
  0xef   : > { %2250 = vmatprep.subr.bf16.mxu1 %v2249_v29  ;;  %v797_v32 = vpop.permute.xlu0 %796 }
  0xf0   : > { %v814_v33 = vsel %vm812_vm9, %v797_v32, %v799_v31  ;;  %2252 = vmatpush1.bf16.msra.mxu1 %v2251_v30  ;;  %1272 = vrot.lane.b32.xlu1 %v2521_v6, %s3426_s11 }
  0xf1   : > { %830 = vst [vmem:[#allocation2 + $0x148] sm:$0xf] %v814_v33  ;;  %1270 = vrot.lane.b32.xlu0 %v2517_v5, %s3426_s11 }
  0xf2   : > { %v842_v34 = vpop.permute.xlu1 %841 }
  0xf3   : > { %v840_v35 = vpop.permute.xlu0 %839 }
  0xf4   : > { %v857_v36 = vsel %vm855_vm10, %v840_v35, %v842_v34  ;;  %1315 = vrot.lane.b32.xlu1 %v2521_v6, %s3424_s8  ;;  %v1568_v46 = vld [vmem:[#allocation2 + $0x108] sm:$0xff] }
  0xf5   : > { %873 = vst [vmem:[#allocation2 + $0x148] sm:$0xf0] %v857_v36  ;;  %1313 = vrot.lane.b32.xlu0 %v2502_v0, %s3424_s8 }
  0xf6   : > { %v752_v38 = vpop.permute.xlu1 %751 }
  0xf7   : > { %v770_v39 = vsel %vm769_vm8, %v752_v38, %v754_v23  ;;  %v709_v40 = vpop.permute.xlu0 %708 }
  0xf8   : > { %786 = vst [vmem:[#allocation2 + $0x100] sm:$0xf0] %v770_v39  ;;  %v727_v41 = vsel %vm726_vm7, %v709_v40, %v711_v20  ;;  %1358 = vrot.lane.b32.xlu1 %v2521_v6, %s3422_s7 }
  0xf9   : > { %743 = vst [vmem:[#allocation2 + $0x100] sm:$0xf] %v727_v41  ;;  %1356 = vrot.lane.b32.xlu0 %v2517_v5, %s3422_s7 }
  0xfa   : > { %v838_v42 = vpop.permute.xlu1 %837 }
  0xfb   : > { %v856_v43 = vsel %vm855_vm10, %v838_v42, %v840_v35  ;;  %v795_v44 = vpop.permute.xlu0 %794 }
  0xfc   : > { %872 = vst [vmem:[#allocation2 + $0x140] sm:$0xf0] %v856_v43  ;;  %v813_v45 = vsel %vm812_vm9, %v795_v44, %v797_v32  ;;  %1268 = vrot.lane.b32.xlu1 %v2533_v9, %s3426_s11  ;;  %v1576_v47 = vld [vmem:[#allocation2 + $0x148] sm:$0xff] }
  0xfd   : > { %829 = vst [vmem:[#allocation2 + $0x140] sm:$0xf] %v813_v45  ;;  %1225 = vrot.lane.b32.xlu0 %v2533_v9, %s2431_s10  ;;  %v2225_v48 = vpack.c.bf16 %v1576_v47, %v1568_v46 }
  0xfe   : > { %v2831_v49 = vpop.permute.xlu1 %716 }
  0xff   : > { %v715_v50 = vpop.permute.xlu0 %714  ;;  %2226 = vmatprep.subr.bf16.mxu0 %v2225_v48 }
 0x100   : > { %v729_v51 = vsel %vm726_vm7, %v713_v19, %v715_v50  ;;  %v730_v52 = vsel %vm726_vm7, %v715_v50, %v2831_v49  ;;  %1354 = vrot.lane.b32.xlu1 %v2533_v9, %s3422_s7  ;;  %v1567_v56 = vld [vmem:[#allocation2 + $0x100] sm:$0xff] }
 0x101   : > { %745 = vst [vmem:[#allocation2 + $0x110] sm:$0xf] %v729_v51  ;;  %746 = vst [vmem:[#allocation2 + $0x118] sm:$0xf] %v730_v52  ;;  %1311 = vrot.lane.b32.xlu0 %v2533_v9, %s3424_s8 }
 0x102   : > { %v2840_v8 = vpop.permute.xlu1 %759 }
 0x103   : > { %v758_v54 = vpop.permute.xlu0 %757 }
 0x104   : > { %v772_v7 = vsel %vm769_vm8, %v2801_v22, %v758_v54  ;;  %v773_v55 = vsel %vm769_vm8, %v758_v54, %v2840_v8  ;;  %1233 = vrot.lane.b32.xlu1 %v2510_v3, %s2431_s10  ;;  %v1575_v57 = vld [vmem:[#allocation2 + $0x140] sm:$0xff]  ;;  %v2435_v22 = vmov 0.0  }
 0x105   : > { %788 = vst [vmem:[#allocation2 + $0x110] sm:$0xf0] %v772_v7  ;;  %789 = vst [vmem:[#allocation2 + $0x118] sm:$0xf0] %v773_v55  ;;  %1231 = vrot.lane.b32.xlu0 %v2504_v1, %s2431_s10  ;;  %v2227_v59 = vpack.c.bf16 %v1575_v57, %v1567_v56  ;;  %1721 = vmatprep.mubr.f32.mxu0 %v2435_v22 }
 0x106   : > { %v2850_v60 = vpop.permute.xlu1 %802  ;;  %1527 = vst [vmem:[#allocation2 + $0x348] sm:$0xf0] %v2435_v22  ;;  %1526 = vst [vmem:[#allocation2 + $0x340] sm:$0xf0] %v2435_v22  ;;  %1792 = vmatprep.mubr.f32.mxu1 %v2435_v22 }
 0x107   : > { %v801_v61 = vpop.permute.xlu0 %800  ;;  %2228 = vmatpush1.bf16.msra.mxu0 %v2227_v59  ;;  %1528 = vst [vmem:[#allocation2 + $0x350] sm:$0xf0] %v2435_v22  ;;  %1529 = vst [vmem:[#allocation2 + $0x358] sm:$0xf0] %v2435_v22 }
 0x108   : > { %v815_v62 = vsel %vm812_vm9, %v799_v31, %v801_v61  ;;  %v816_v63 = vsel %vm812_vm9, %v801_v61, %v2850_v60  ;;  %1276 = vrot.lane.b32.xlu1 %v2510_v3, %s3426_s11  ;;  %1530 = vst [vmem:[#allocation2 + $0x360] sm:$0xf0] %v2435_v22  ;;  %1531 = vst [vmem:[#allocation2 + $0x368] sm:$0xf0] %v2435_v22 }
 0x109   : > { %831 = vst [vmem:[#allocation2 + $0x150] sm:$0xf] %v815_v62  ;;  %832 = vst [vmem:[#allocation2 + $0x158] sm:$0xf] %v816_v63  ;;  %1274 = vrot.lane.b32.xlu0 %v2546_v10, %s3426_s11  ;;  %s2438_s11 = smov 34  }
 0x10a   : > { %v2859_v14 = vpop.permute.xlu1 %845  ;;  %1532 = vst [vmem:[#allocation2 + $0x370] sm:$0xf0] %v2435_v22  ;;  %1533 = vst [vmem:[#allocation2 + $0x378] sm:$0xf0] %v2435_v22 }
 0x10b   : > { %v844_v16 = vpop.permute.xlu0 %843 }
 0x10c   : > { %v858_v17 = vsel %vm855_vm10, %v842_v34, %v844_v16  ;;  %v859_v18 = vsel %vm855_vm10, %v844_v16, %v2859_v14  ;;  %1319 = vrot.lane.b32.xlu1 %v2510_v3, %s3424_s8  ;;  %v1570_v25 = vld [vmem:[#allocation2 + $0x118] sm:$0xff]  ;;  %v1569_v28 = vld [vmem:[#allocation2 + $0x110] sm:$0xff] }
 0x10d   : > { %874 = vst [vmem:[#allocation2 + $0x150] sm:$0xf0] %v858_v17  ;;  %875 = vst [vmem:[#allocation2 + $0x158] sm:$0xf0] %v859_v18  ;;  %1317 = vrot.lane.b32.xlu0 %v2504_v1, %s3424_s8  ;;  %s2437_s8 = smov 35  }
 0x10e   : > { %v2868_v19 = vpop.permute.xlu1 %884 }
 0x10f   : > { %v883_v20 = vpop.permute.xlu0 %882 }
 0x110   : > { %v900_v21 = vsel %vm898_vm11, %v883_v20, %v2868_v19  ;;  %1362 = vrot.lane.b32.xlu1 %v2510_v3, %s3422_s7 }
 0x111   : > { %916 = vst [vmem:[#allocation2 + $0x188] sm:$0xf] %v900_v21  ;;  %1360 = vrot.lane.b32.xlu0 %v2546_v10, %s3422_s7  ;;  %s2436_s7 = smov 36  }
 0x112   : > { %v2885_v23 = vpop.permute.xlu1 %927 }
 0x113   : > { %v926_v24 = vpop.permute.xlu0 %925 }
 0x114   : > { %v943_v26 = vsel %vm941_vm12, %v926_v24, %v2885_v23  ;;  %1401 = vrot.lane.b32.xlu1 %v2521_v6, %s2436_s7  ;;  %v1578_v27 = vld [vmem:[#allocation2 + $0x158] sm:$0xff]  ;;  %v1577_v29 = vld [vmem:[#allocation2 + $0x150] sm:$0xff] }
 0x115   : > { %959 = vst [vmem:[#allocation2 + $0x188] sm:$0xf0] %v943_v26  ;;  %1399 = vrot.lane.b32.xlu0 %v2502_v0, %s2436_s7  ;;  %v2253_v30 = vpack.c.bf16 %v1578_v27, %v1570_v25  ;;  %v2255_v31 = vpack.c.bf16 %v1577_v29, %v1569_v28 }
 0x116   : > { %v971_v32 = vpop.permute.xlu1 %970 }
 0x117   : > { %2254 = vmatprep.subr.bf16.mxu1 %v2253_v30  ;;  %v969_v33 = vpop.permute.xlu0 %968 }
 0x118   : > { %v986_v34 = vsel %vm984_vm13, %v969_v33, %v971_v32  ;;  %2256 = vmatpush1.bf16.msra.mxu1 %v2255_v31  ;;  %1444 = vrot.lane.b32.xlu1 %v2521_v6, %s2437_s8 }
 0x119   : > { %1002 = vst [vmem:[#allocation2 + $0x1c8] sm:$0xf] %v986_v34  ;;  %1442 = vrot.lane.b32.xlu0 %v2517_v5, %s2437_s8 }
 0x11a   : > { %v1014_v35 = vpop.permute.xlu1 %1013 }
 0x11b   : > { %v1012_v36 = vpop.permute.xlu0 %1011 }
 0x11c   : > { %v1029_v38 = vsel %vm1027_vm14, %v1012_v36, %v1014_v35  ;;  %1487 = vrot.lane.b32.xlu1 %v2521_v6, %s2438_s11  ;;  %v1584_v44 = vld [vmem:[#allocation2 + $0x188] sm:$0xff] }
 0x11d   : > { %1045 = vst [vmem:[#allocation2 + $0x1c8] sm:$0xf0] %v1029_v38  ;;  %1485 = vrot.lane.b32.xlu0 %v2502_v0, %s2438_s11 }
 0x11e   : > { %v924_v39 = vpop.permute.xlu1 %923 }
 0x11f   : > { %v942_v40 = vsel %vm941_vm12, %v924_v39, %v926_v24  ;;  %v881_v41 = vpop.permute.xlu0 %880 }
 0x120   : > { %958 = vst [vmem:[#allocation2 + $0x180] sm:$0xf0] %v942_v40  ;;  %v899_v5 = vsel %vm898_vm11, %v881_v41, %v883_v20  ;;  %1440 = vrot.lane.b32.xlu1 %v2533_v9, %s2437_s8  ;;  %v2977_v41 = vld [vmem:[%s2551_s9] sm:$0xff]  ;;  %s3436_s9 = smov 56  }
 0x121   : > { %915 = vst [vmem:[#allocation2 + $0x180] sm:$0xf] %v899_v5  ;;  %1397 = vrot.lane.b32.xlu0 %v2533_v9, %s2436_s7 }
 0x122   : > { %v1010_v42 = vpop.permute.xlu1 %1009 }
 0x123   : > { %v1028_v6 = vsel %vm1027_vm14, %v1010_v42, %v1012_v36  ;;  %v967_v43 = vpop.permute.xlu0 %966 }
 0x124   : > { %1044 = vst [vmem:[#allocation2 + $0x1c0] sm:$0xf0] %v1028_v6  ;;  %v985_v0 = vsel %vm984_vm13, %v967_v43, %v969_v33  ;;  %1403 = vrot.lane.b32.xlu1 %v2504_v1, %s2436_s7  ;;  %v1592_v45 = vld [vmem:[#allocation2 + $0x1c8] sm:$0xff] }
 0x125   : > { %1001 = vst [vmem:[#allocation2 + $0x1c0] sm:$0xf] %v985_v0  ;;  %1483 = vrot.lane.b32.xlu0 %v2533_v9, %s2438_s11  ;;  %v2229_v46 = vpack.c.bf16 %v1592_v45, %v1584_v44 }
 0x126   : > { %v2916_v47 = vpop.permute.xlu1 %888 }
 0x127   : > { %v887_v48 = vpop.permute.xlu0 %886  ;;  %2230 = vmatprep.subr.bf16.mxu0 %v2229_v46 }
 0x128   : > { %v901_v50 = vsel %vm898_vm11, %v2868_v19, %v887_v48  ;;  %v902_v51 = vsel %vm898_vm11, %v887_v48, %v2916_v47  ;;  %1446 = vrot.lane.b32.xlu1 %v2546_v10, %s2437_s8  ;;  %v1583_v55 = vld [vmem:[#allocation2 + $0x180] sm:$0xff] }
 0x129   : > { %917 = vst [vmem:[#allocation2 + $0x190] sm:$0xf] %v901_v50  ;;  %918 = vst [vmem:[#allocation2 + $0x198] sm:$0xf] %v902_v51  ;;  %1405 = vrot.lane.b32.xlu0 %v2510_v3, %s2436_s7 }
 0x12a   : > { %v2926_v9 = vpop.permute.xlu1 %931 }
 0x12b   : > { %v930_v52 = vpop.permute.xlu0 %929 }
 0x12c   : > { %v944_v54 = vsel %vm941_vm12, %v2885_v23, %v930_v52  ;;  %v945_v7 = vsel %vm941_vm12, %v930_v52, %v2926_v9  ;;  %1489 = vrot.lane.b32.xlu1 %v2504_v1, %s2438_s11  ;;  %v1591_v56 = vld [vmem:[#allocation2 + $0x1c0] sm:$0xff] }
 0x12d   : > { %960 = vst [vmem:[#allocation2 + $0x190] sm:$0xf0] %v944_v54  ;;  %961 = vst [vmem:[#allocation2 + $0x198] sm:$0xf0] %v945_v7  ;;  %1448 = vrot.lane.b32.xlu0 %v2510_v3, %s2437_s8  ;;  %v2231_v10 = vpack.c.bf16 %v1591_v56, %v1583_v55 }
 0x12e   : > { %v2936_v57 = vpop.permute.xlu1 %974 }
 0x12f   : > { %v973_v59 = vpop.permute.xlu0 %972  ;;  %2232 = vmatpush1.bf16.msra.mxu0 %v2231_v10 }
 0x130   : > { %v987_v61 = vsel %vm984_vm13, %v971_v32, %v973_v59  ;;  %v988_v62 = vsel %vm984_vm13, %v973_v59, %v2936_v57  ;;  %548 = vrot.lane.b32.xlu1 %v2506_v2, %s2415_s12 }
 0x131   : > { %1003 = vst [vmem:[#allocation2 + $0x1d0] sm:$0xf] %v987_v61  ;;  %1004 = vst [vmem:[#allocation2 + $0x1d8] sm:$0xf] %v988_v62  ;;  %1491 = vrot.lane.b32.xlu0 %v2510_v3, %s2438_s11 }
 0x132   : > { %v2945_v1 = vpop.permute.xlu1 %1017 }
 0x133   : > { %v1016_v63 = vpop.permute.xlu0 %1015 }
 0x134   : > { %v1030_v16 = vsel %vm1027_vm14, %v1014_v35, %v1016_v63  ;;  %v1031_v17 = vsel %vm1027_vm14, %v1016_v63, %v2945_v1  ;;  %591 = vrot.lane.b32.xlu1 %v2556_v11, %s2416_s13  ;;  %v1586_v24 = vld [vmem:[#allocation2 + $0x198] sm:$0xff]  ;;  %v1585_v27 = vld [vmem:[#allocation2 + $0x190] sm:$0xff] }
 0x135   : > { %1046 = vst [vmem:[#allocation2 + $0x1d0] sm:$0xf0] %v1030_v16  ;;  %1047 = vst [vmem:[#allocation2 + $0x1d8] sm:$0xf0] %v1031_v17  ;;  %589 = vrot.lane.b32.xlu0 %v2510_v3, %s2416_s13 }
 0x136   : > { %v1057_v18 = vpop.permute.xlu1 %1056 }
 0x137   : > { %v1055_v19 = vpop.permute.xlu0 %1054 }
 0x138   : > { %v1072_v20 = vsel %vm3431_vm15, %v1055_v19, %v1057_v18  ;;  %634 = vrot.lane.b32.xlu1 %v2506_v2, %s2417_s14 }
 0x139   : > { %1088 = vst [vmem:[#allocation2 + $0x208] sm:$0xf] %v1072_v20  ;;  %632 = vrot.lane.b32.xlu0 %v2510_v3, %s2417_s14 }
 0x13a   : > { %v1100_v21 = vpop.permute.xlu1 %1099 }
 0x13b   : > { %v1098_v23 = vpop.permute.xlu0 %1097 }
 0x13c   : > { %v1115_v25 = vsel %vm3430_vm0, %v1098_v23, %v1100_v21  ;;  %677 = vrot.lane.b32.xlu1 %v2556_v11, %s2418_s15  ;;  %v1594_v26 = vld [vmem:[#allocation2 + $0x1d8] sm:$0xff]  ;;  %v1593_v28 = vld [vmem:[#allocation2 + $0x1d0] sm:$0xff] }
 0x13d   : > { %1131 = vst [vmem:[#allocation2 + $0x208] sm:$0xf0] %v1115_v25  ;;  %675 = vrot.lane.b32.xlu0 %v2510_v3, %s2418_s15  ;;  %v2257_v29 = vpack.c.bf16 %v1594_v26, %v1586_v24  ;;  %v2259_v30 = vpack.c.bf16 %v1593_v28, %v1585_v27 }
 0x13e   : > { %v1143_v31 = vpop.permute.xlu1 %1142 }
 0x13f   : > { %2258 = vmatprep.subr.bf16.mxu1 %v2257_v29  ;;  %v1141_v32 = vpop.permute.xlu0 %1140 }
 0x140   : > { %v1158_v33 = vsel %vm3428_vm1, %v1141_v32, %v1143_v31  ;;  %2260 = vmatpush1.bf16.msra.mxu1 %v2259_v30  ;;  %552 = vrot.lane.b32.xlu1 %v2559_v12, %s2415_s12 }
 0x141   : > { %1174 = vst [vmem:[#allocation2 + $0x248] sm:$0xf] %v1158_v33  ;;  %550 = vrot.lane.b32.xlu0 %v2514_v4, %s2415_s12  ;;  %s3437_s12 = smov 55  }
 0x142   : > { %v1187_v34 = vpop.permute.xlu1 %1186 }
 0x143   : > { %v1185_v35 = vpop.permute.xlu0 %1184 }
 0x144   : > { %v1202_v36 = vsel %vm3429_vm2, %v1185_v35, %v1187_v34  ;;  %595 = vrot.lane.b32.xlu1 %v2564_v13, %s2416_s13  ;;  %v1600_v0 = vld [vmem:[#allocation2 + $0x208] sm:$0xff] }
 0x145   : > { %1218 = vst [vmem:[#allocation2 + $0x248] sm:$0xf0] %v1202_v36  ;;  %593 = vrot.lane.b32.xlu0 %v2514_v4, %s2416_s13 }
 0x146   : > { %v1096_v38 = vpop.permute.xlu1 %1095 }
 0x147   : > { %v1114_v39 = vsel %vm3430_vm0, %v1096_v38, %v1098_v23  ;;  %v1053_v12 = vpop.permute.xlu0 %1052 }
 0x148   : > { %1130 = vst [vmem:[#allocation2 + $0x200] sm:$0xf0] %v1114_v39  ;;  %v1071_v40 = vsel %vm3431_vm15, %v1053_v12, %v1055_v19  ;;  %638 = vrot.lane.b32.xlu1 %v2977_v41, %s2417_s14 }
 0x149   : > { %1087 = vst [vmem:[#allocation2 + $0x200] sm:$0xf] %v1071_v40  ;;  %636 = vrot.lane.b32.xlu0 %v2514_v4, %s2417_s14 }
 0x14a   : > { %v1183_v5 = vpop.permute.xlu1 %1182 }
 0x14b   : > { %v1201_v42 = vsel %vm3429_vm2, %v1183_v5, %v1185_v35  ;;  %v1139_v6 = vpop.permute.xlu0 %1138 }
 0x14c   : > { %1217 = vst [vmem:[#allocation2 + $0x240] sm:$0xf0] %v1201_v42  ;;  %v1157_v43 = vsel %vm3428_vm1, %v1139_v6, %v1141_v32  ;;  %681 = vrot.lane.b32.xlu1 %v2564_v13, %s2418_s15  ;;  %v1608_v44 = vld [vmem:[#allocation2 + $0x248] sm:$0xff] }
 0x14d   : > { %1173 = vst [vmem:[#allocation2 + $0x240] sm:$0xf] %v1157_v43  ;;  %679 = vrot.lane.b32.xlu0 %v2514_v4, %s2418_s15  ;;  %v2233_v45 = vpack.c.bf16 %v1608_v44, %v1600_v0  ;;  %s3438_s15 = smov 46  }
 0x14e   : > { %v2989_v46 = vpop.permute.xlu1 %1060 }
 0x14f   : > { %v1059_v48 = vpop.permute.xlu0 %1058  ;;  %2234 = vmatprep.subr.bf16.mxu0 %v2233_v45 }
 0x150   : > { %v1073_v50 = vsel %vm3431_vm15, %v1057_v18, %v1059_v48  ;;  %v1074_v51 = vsel %vm3431_vm15, %v1059_v48, %v2989_v46  ;;  %720 = vrot.lane.b32.xlu1 %v2506_v2, %s2419_s16  ;;  %v1599_v56 = vld [vmem:[#allocation2 + $0x200] sm:$0xff]  ;;  %vm3433_vm15 = vcmask 359424  }
 0x151   : > { %1089 = vst [vmem:[#allocation2 + $0x210] sm:$0xf] %v1073_v50  ;;  %1090 = vst [vmem:[#allocation2 + $0x218] sm:$0xf] %v1074_v51  ;;  %718 = vrot.lane.b32.xlu0 %v2510_v3, %s2419_s16 }
 0x152   : > { %v2998_v52 = vpop.permute.xlu1 %1103 }
 0x153   : > { %v1102_v54 = vpop.permute.xlu0 %1101 }
 0x154   : > { %v1116_v7 = vsel %vm3430_vm0, %v1100_v21, %v1102_v54  ;;  %v1117_v55 = vsel %vm3430_vm0, %v1102_v54, %v2998_v52  ;;  %763 = vrot.lane.b32.xlu1 %v2556_v11, %s2420_s17  ;;  %v1607_v10 = vld [vmem:[#allocation2 + $0x240] sm:$0xff]  ;;  %vm3432_vm0 = vcmask 367616  }
 0x155   : > { %1132 = vst [vmem:[#allocation2 + $0x210] sm:$0xf0] %v1116_v7  ;;  %1133 = vst [vmem:[#allocation2 + $0x218] sm:$0xf0] %v1117_v55  ;;  %761 = vrot.lane.b32.xlu0 %v2510_v3, %s2420_s17  ;;  %v2235_v59 = vpack.c.bf16 %v1607_v10, %v1599_v56 }
 0x156   : > { %v3007_v61 = vpop.permute.xlu1 %1146 }
 0x157   : > { %v1145_v62 = vpop.permute.xlu0 %1144  ;;  %2236 = vmatpush1.bf16.msra.mxu0 %v2235_v59 }
 0x158   : > { %v1159_v63 = vsel %vm3428_vm1, %v1143_v31, %v1145_v62  ;;  %v1160_v16 = vsel %vm3428_vm1, %v1145_v62, %v3007_v61  ;;  %806 = vrot.lane.b32.xlu1 %v2506_v2, %s2421_s18  ;;  %vm1243_vm1 = vcmask 441344  }
 0x159   : > { %1175 = vst [vmem:[#allocation2 + $0x250] sm:$0xf] %v1159_v63  ;;  %1176 = vst [vmem:[#allocation2 + $0x258] sm:$0xf] %v1160_v16  ;;  %804 = vrot.lane.b32.xlu0 %v2510_v3, %s2421_s18 }
 0x15a   : > { %v3016_v17 = vpop.permute.xlu1 %1190 }
 0x15b   : > { %v1189_v18 = vpop.permute.xlu0 %1188 }
 0x15c   : > { %v1203_v19 = vsel %vm3429_vm2, %v1187_v34, %v1189_v18  ;;  %v1204_v20 = vsel %vm3429_vm2, %v1189_v18, %v3016_v17  ;;  %849 = vrot.lane.b32.xlu1 %v2556_v11, %s2422_s19  ;;  %vm3434_vm2 = vcmask 375808   ;;  %v1602_v27 = vld [vmem:[#allocation2 + $0x218] sm:$0xff]  ;;  %v1601_v30 = vld [vmem:[#allocation2 + $0x210] sm:$0xff] }
 0x15d   : > { %1219 = vst [vmem:[#allocation2 + $0x250] sm:$0xf0] %v1203_v19  ;;  %1220 = vst [vmem:[#allocation2 + $0x258] sm:$0xf0] %v1204_v20  ;;  %847 = vrot.lane.b32.xlu0 %v2510_v3, %s2422_s19 }
 0x15e   : > { %v1230_v21 = vpop.permute.xlu1 %1229 }
 0x15f   : > { %v1228_v23 = vpop.permute.xlu0 %1227 }
 0x160   : > { %v1245_v24 = vsel %vm1243_vm1, %v1228_v23, %v1230_v21  ;;  %724 = vrot.lane.b32.xlu1 %v2977_v41, %s2419_s16 }
 0x161   : > { %1261 = vst [vmem:[#allocation2 + $0x288] sm:$0xf] %v1245_v24  ;;  %722 = vrot.lane.b32.xlu0 %v2514_v4, %s2419_s16  ;;  %s3439_s16 = smov 45  }
 0x162   : > { %v1273_v25 = vpop.permute.xlu1 %1272 }
 0x163   : > { %v1271_v26 = vpop.permute.xlu0 %1270 }
 0x164   : > { %v1288_v28 = vsel %vm3434_vm2, %v1271_v26, %v1273_v25  ;;  %767 = vrot.lane.b32.xlu1 %v2564_v13, %s2420_s17  ;;  %v1610_v29 = vld [vmem:[#allocation2 + $0x258] sm:$0xff]  ;;  %v1609_v31 = vld [vmem:[#allocation2 + $0x250] sm:$0xff] }
 0x165   : > { %1304 = vst [vmem:[#allocation2 + $0x288] sm:$0xf0] %v1288_v28  ;;  %765 = vrot.lane.b32.xlu0 %v2514_v4, %s2420_s17  ;;  %v2261_v32 = vpack.c.bf16 %v1610_v29, %v1602_v27  ;;  %v2263_v33 = vpack.c.bf16 %v1609_v31, %v1601_v30  ;;  %s3440_s17 = smov 44  }
 0x166   : > { %v1316_v34 = vpop.permute.xlu1 %1315 }
 0x167   : > { %2262 = vmatprep.subr.bf16.mxu1 %v2261_v32  ;;  %v1314_v35 = vpop.permute.xlu0 %1313 }
 0x168   : > { %v1331_v36 = vsel %vm3432_vm0, %v1314_v35, %v1316_v34  ;;  %2264 = vmatpush1.bf16.msra.mxu1 %v2263_v33  ;;  %810 = vrot.lane.b32.xlu1 %v2977_v41, %s2421_s18 }
 0x169   : > { %1347 = vst [vmem:[#allocation2 + $0x2c8] sm:$0xf] %v1331_v36  ;;  %808 = vrot.lane.b32.xlu0 %v2514_v4, %s2421_s18 }
 0x16a   : > { %v1359_v38 = vpop.permute.xlu1 %1358 }
 0x16b   : > { %v1357_v39 = vpop.permute.xlu0 %1356 }
 0x16c   : > { %v1374_v12 = vsel %vm3433_vm15, %v1357_v39, %v1359_v38  ;;  %853 = vrot.lane.b32.xlu1 %v2564_v13, %s2422_s19  ;;  %v1616_v48 = vld [vmem:[#allocation2 + $0x288] sm:$0xff] }
 0x16d   : > { %1390 = vst [vmem:[#allocation2 + $0x2c8] sm:$0xf0] %v1374_v12  ;;  %851 = vrot.lane.b32.xlu0 %v2514_v4, %s2422_s19 }
 0x16e   : > { %v1269_v40 = vpop.permute.xlu1 %1268 }
 0x16f   : > { %v1287_v5 = vsel %vm3434_vm2, %v1269_v40, %v1271_v26  ;;  %v1226_v42 = vpop.permute.xlu0 %1225 }
 0x170   : > { %1303 = vst [vmem:[#allocation2 + $0x280] sm:$0xf0] %v1287_v5  ;;  %v1244_v6 = vsel %vm1243_vm1, %v1226_v42, %v1228_v23  ;;  %892 = vrot.lane.b32.xlu1 %v2506_v2, %s2423_s20 }
 0x171   : > { %1260 = vst [vmem:[#allocation2 + $0x280] sm:$0xf] %v1244_v6  ;;  %890 = vrot.lane.b32.xlu0 %v2510_v3, %s2423_s20 }
 0x172   : > { %v1355_v43 = vpop.permute.xlu1 %1354 }
 0x173   : > { %v1373_v0 = vsel %vm3433_vm15, %v1355_v43, %v1357_v39  ;;  %v1312_v44 = vpop.permute.xlu0 %1311 }
 0x174   : > { %1389 = vst [vmem:[#allocation2 + $0x2c0] sm:$0xf0] %v1373_v0  ;;  %v1330_v45 = vsel %vm3432_vm0, %v1312_v44, %v1314_v35  ;;  %935 = vrot.lane.b32.xlu1 %v2556_v11, %s2424_s26  ;;  %v1624_v50 = vld [vmem:[#allocation2 + $0x2c8] sm:$0xff] }
 0x175   : > { %1346 = vst [vmem:[#allocation2 + $0x2c0] sm:$0xf] %v1330_v45  ;;  %933 = vrot.lane.b32.xlu0 %v2510_v3, %s2424_s26  ;;  %v2237_v51 = vpack.c.bf16 %v1624_v50, %v1616_v48 }
 0x176   : > { %v3057_v54 = vpop.permute.xlu1 %1233 }
 0x177   : > { %v1232_v7 = vpop.permute.xlu0 %1231  ;;  %2238 = vmatprep.subr.bf16.mxu0 %v2237_v51 }
 0x178   : > { %v1246_v55 = vsel %vm1243_vm1, %v1230_v21, %v1232_v7  ;;  %v1247_v56 = vsel %vm1243_vm1, %v1232_v7, %v3057_v54  ;;  %978 = vrot.lane.b32.xlu1 %v2506_v2, %s2425_s27  ;;  %v1615_v16 = vld [vmem:[#allocation2 + $0x280] sm:$0xff] }
 0x179   : > { %1262 = vst [vmem:[#allocation2 + $0x290] sm:$0xf] %v1246_v55  ;;  %1263 = vst [vmem:[#allocation2 + $0x298] sm:$0xf] %v1247_v56  ;;  %976 = vrot.lane.b32.xlu0 %v2510_v3, %s2425_s27 }
 0x17a   : > { %v3066_v10 = vpop.permute.xlu1 %1276 }
 0x17b   : > { %v1275_v59 = vpop.permute.xlu0 %1274 }
 0x17c   : > { %v1289_v62 = vsel %vm3434_vm2, %v1273_v25, %v1275_v59  ;;  %v1290_v63 = vsel %vm3434_vm2, %v1275_v59, %v3066_v10  ;;  %1021 = vrot.lane.b32.xlu1 %v2556_v11, %s2426_s28  ;;  %v1623_v18 = vld [vmem:[#allocation2 + $0x2c0] sm:$0xff]  ;;  %vm1501_vm2 = vcmask 277504  }
 0x17d   : > { %1305 = vst [vmem:[#allocation2 + $0x290] sm:$0xf0] %v1289_v62  ;;  %1306 = vst [vmem:[#allocation2 + $0x298] sm:$0xf0] %v1290_v63  ;;  %1019 = vrot.lane.b32.xlu0 %v2510_v3, %s2426_s28  ;;  %v2239_v19 = vpack.c.bf16 %v1623_v18, %v1615_v16 }
 0x17e   : > { %v3075_v20 = vpop.permute.xlu1 %1319 }
 0x17f   : > { %v1318_v21 = vpop.permute.xlu0 %1317  ;;  %2240 = vmatpush1.bf16.msra.mxu0 %v2239_v19 }
 0x180   : > { %v1332_v23 = vsel %vm3432_vm0, %v1316_v34, %v1318_v21  ;;  %v1333_v24 = vsel %vm3432_vm0, %v1318_v21, %v3075_v20  ;;  %896 = vrot.lane.b32.xlu1 %v2977_v41, %s2423_s20  ;;  %vm1415_vm0 = vcmask 293888  }
 0x181   : > { %1348 = vst [vmem:[#allocation2 + $0x2d0] sm:$0xf] %v1332_v23  ;;  %1349 = vst [vmem:[#allocation2 + $0x2d8] sm:$0xf] %v1333_v24  ;;  %894 = vrot.lane.b32.xlu0 %v2514_v4, %s2423_s20  ;;  %v1548_v23 = vld [vmem:[#allocation2 + $0x68] sm:$0xff] }
 0x182   : > { %v3084_v25 = vpop.permute.xlu1 %1362 }
 0x183   : > { %v1361_v26 = vpop.permute.xlu0 %1360 }
 0x184   : > { %v1375_v27 = vsel %vm3433_vm15, %v1359_v38, %v1361_v26  ;;  %v1376_v28 = vsel %vm3433_vm15, %v1361_v26, %v3084_v25  ;;  %939 = vrot.lane.b32.xlu1 %v2564_v13, %s2424_s26  ;;  %vm3435_vm15 = vcmask 285696   ;;  %v1618_v34 = vld [vmem:[#allocation2 + $0x298] sm:$0xff]  ;;  %v1617_v38 = vld [vmem:[#allocation2 + $0x290] sm:$0xff] }
 0x185   : > { %1391 = vst [vmem:[#allocation2 + $0x2d0] sm:$0xf0] %v1375_v27  ;;  %1392 = vst [vmem:[#allocation2 + $0x2d8] sm:$0xf0] %v1376_v28  ;;  %937 = vrot.lane.b32.xlu0 %v2514_v4, %s2424_s26 }
 0x186   : > { %v1402_v29 = vpop.permute.xlu1 %1401 }
 0x187   : > { %v1400_v30 = vpop.permute.xlu0 %1399 }
 0x188   : > { %v1417_v31 = vsel %vm1415_vm0, %v1400_v30, %v1402_v29  ;;  %982 = vrot.lane.b32.xlu1 %v2977_v41, %s2425_s27 }
 0x189   : > { %1433 = vst [vmem:[#allocation2 + $0x308] sm:$0xf] %v1417_v31  ;;  %980 = vrot.lane.b32.xlu0 %v2514_v4, %s2425_s27 }
 0x18a   : > { %v1445_v32 = vpop.permute.xlu1 %1444 }
 0x18b   : > { %v1443_v33 = vpop.permute.xlu0 %1442 }
 0x18c   : > { %v1460_v35 = vsel %vm3435_vm15, %v1443_v33, %v1445_v32  ;;  %1025 = vrot.lane.b32.xlu1 %v2564_v13, %s2426_s28  ;;  %v1626_v36 = vld [vmem:[#allocation2 + $0x2d8] sm:$0xff]  ;;  %v1625_v39 = vld [vmem:[#allocation2 + $0x2d0] sm:$0xff] }
 0x18d   : > { %1476 = vst [vmem:[#allocation2 + $0x308] sm:$0xf0] %v1460_v35  ;;  %1023 = vrot.lane.b32.xlu0 %v2514_v4, %s2426_s28  ;;  %v2265_v12 = vpack.c.bf16 %v1626_v36, %v1618_v34  ;;  %v2267_v40 = vpack.c.bf16 %v1625_v39, %v1617_v38  ;;  %v3148_v35 = vld [vmem:[%s3411_s0] sm:$0xff] }
 0x18e   : > { %v1488_v5 = vpop.permute.xlu1 %1487  ;;  %v1539_v38 = vld [vmem:[#allocation2 + $0x20] sm:$0xff] }
 0x18f   : > { %2266 = vmatprep.subr.bf16.mxu1 %v2265_v12  ;;  %v1486_v42 = vpop.permute.xlu0 %1485 }
 0x190   : > { %v1503_v6 = vsel %vm1501_vm2, %v1486_v42, %v1488_v5  ;;  %2268 = vmatpush1.bf16.msra.mxu1 %v2267_v40  ;;  %1064 = vrot.lane.b32.xlu1 %v2506_v2, %s2427_s29 }
 0x191   : > { %1519 = vst [vmem:[#allocation2 + $0x348] sm:$0xf] %v1503_v6  ;;  %1062 = vrot.lane.b32.xlu0 %v2510_v3, %s2427_s29 }
 0x192   : > { %v1441_v43 = vpop.permute.xlu1 %1440 }
 0x193   : > { %v1459_v0 = vsel %vm3435_vm15, %v1441_v43, %v1443_v33  ;;  %v1398_v44 = vpop.permute.xlu0 %1397 }
 0x194   : > { %1475 = vst [vmem:[#allocation2 + $0x300] sm:$0xf0] %v1459_v0  ;;  %v1416_v45 = vsel %vm1415_vm0, %v1398_v44, %v1400_v30  ;;  %1107 = vrot.lane.b32.xlu1 %v2556_v11, %s2428_s30  ;;  %v1632_v55 = vld [vmem:[#allocation2 + $0x308] sm:$0xff] }
 0x195   : > { %1432 = vst [vmem:[#allocation2 + $0x300] sm:$0xf] %v1416_v45  ;;  %1105 = vrot.lane.b32.xlu0 %v2510_v3, %s2428_s30 }
 0x196   : > { %v1404_v48 = vpop.permute.xlu1 %1403 }
 0x197   : > { %v1418_v50 = vsel %vm1415_vm0, %v1402_v29, %v1404_v48  ;;  %v1484_v51 = vpop.permute.xlu0 %1483  ;;  %v1540_v29 = vld [vmem:[#allocation2 + $0x28] sm:$0xff] }
 0x198   : > { %1434 = vst [vmem:[#allocation2 + $0x310] sm:$0xf] %v1418_v50  ;;  %v1502_v7 = vsel %vm1501_vm2, %v1484_v51, %v1486_v42  ;;  %1150 = vrot.lane.b32.xlu1 %v2514_v4, %s3436_s9  ;;  %v1640_v56 = vld [vmem:[#allocation2 + $0x348] sm:$0xff]  ;;  %v2273_v31 = vpack.c.bf16 %v1548_v23, %v1540_v29  ;;  %v1550_v50 = vld [vmem:[#allocation2 + $0x78] sm:$0xff] }
 0x199   : > { %1518 = vst [vmem:[#allocation2 + $0x340] sm:$0xf] %v1502_v7  ;;  %1148 = vrot.lane.b32.xlu0 %v2506_v2, %s3436_s9  ;;  %v2241_v59 = vpack.c.bf16 %v1640_v56, %v1632_v55 }
 0x19a   : > { %v1447_v62 = vpop.permute.xlu1 %1446 }
 0x19b   : > { %v1461_v3 = vsel %vm3435_vm15, %v1445_v32, %v1447_v62  ;;  %v3121_v63 = vpop.permute.xlu0 %1405  ;;  %2242 = vmatprep.subr.bf16.mxu0 %v2241_v59  ;;  %v1547_v32 = vld [vmem:[#allocation2 + $0x60] sm:$0xff]  ;;  %v1542_v59 = vld [vmem:[#allocation2 + $0x38] sm:$0xff] }
 0x19c   : > { %1477 = vst [vmem:[#allocation2 + $0x310] sm:$0xf0] %v1461_v3  ;;  %v1419_v16 = vsel %vm1415_vm0, %v1404_v48, %v3121_v63  ;;  %1194 = vrot.lane.b32.xlu1 %v2514_v4, %s3437_s12  ;;  %v1631_v26 = vld [vmem:[#allocation2 + $0x300] sm:$0xff]  ;;  %v2275_v39 = vpack.c.bf16 %v1547_v32, %v1539_v38  ;;  %v1549_v3 = vld [vmem:[#allocation2 + $0x70] sm:$0xff] }
 0x19d   : > { %1435 = vst [vmem:[#allocation2 + $0x318] sm:$0xf] %v1419_v16  ;;  %1192 = vrot.lane.b32.xlu0 %v2556_v11, %s3437_s12 }
 0x19e   : > { %v1490_v18 = vpop.permute.xlu1 %1489 }
 0x19f   : > { %v1504_v19 = vsel %vm1501_vm2, %v1488_v5, %v1490_v18  ;;  %v3130_v21 = vpop.permute.xlu0 %1448 }
 0x1a0   : > { %1520 = vst [vmem:[#allocation2 + $0x350] sm:$0xf] %v1504_v19  ;;  %v1462_v24 = vsel %vm3435_vm15, %v1447_v62, %v3130_v21  ;;  %1068 = vrot.lane.b32.xlu1 %v2977_v41, %s2427_s29  ;;  %v1639_v27 = vld [vmem:[#allocation2 + $0x340] sm:$0xff]  ;;  %vm1653_vm15 = vcmask 916480   ;;  %v2301_v62 = vpack.c.bf16 %v1550_v50, %v1542_v59  ;;  %v1541_v19 = vld [vmem:[#allocation2 + $0x30] sm:$0xff] }
 0x1a1   : > { %1478 = vst [vmem:[#allocation2 + $0x318] sm:$0xf0] %v1462_v24  ;;  %1066 = vrot.lane.b32.xlu0 %v2514_v4, %s2427_s29  ;;  %v2243_v28 = vpack.c.bf16 %v1639_v27, %v1631_v26  ;;  %v2303_v24 = vpack.c.bf16 %v1549_v3, %v1541_v19  ;;  %s3367_s29 = scalar_lea.vmem %s3416_s5, %s2496_s25  ;;  %s2205_s25 = sshll.u32 %s3478_s21, 3 }
 0x1a2   : > { %v3138_v30 = vpop.permute.xlu1 %548 }
 0x1a3   : > { %v560_v33 = vsel %vm554_vm3, %v2739_v37, %v3138_v30  ;;  %v3143_v34 = vpop.permute.xlu0 %1491  ;;  %2244 = vmatpush1.bf16.msra.mxu0 %v2243_v28  ;;  %v3156_v37 = vcombine.high %v2977_v41, %v2977_v41  ;;  %v1633_v7 = vld [vmem:[#allocation2 + $0x310] sm:$0xff] }
 0x1a4   : > { %576 = vst [vmem:[#allocation2 + $0xa8] sm:$0xf] %v560_v33  ;;  %v1505_v36 = vsel %vm1501_vm2, %v1490_v18, %v3143_v34  ;;  %2274 = vmatprep.subr.bf16.mxu0 %v2273_v31  ;;  %1111 = vrot.lane.b32.xlu1 %v2564_v13, %s2428_s30 }
 0x1a5   : > { %1521 = vst [vmem:[#allocation2 + $0x358] sm:$0xf] %v1505_v36  ;;  %1109 = vrot.lane.b32.xlu0 %v2514_v4, %s2428_s30 }
 0x1a6   : > { %v592_v12 = vpop.permute.xlu1 %591  ;;  %2206 = vmatmul.mubr.msk.f32.vlgmr.msra.gmra.mrb[0].mxu0 %vm1653_vm15, %v3148_v35 }
 0x1a7   : > { %v590_v40 = vpop.permute.xlu0 %589  ;;  %2276 = vmatpush1.bf16.msra.mxu0 %v2275_v39  ;;  %1863 = vmatprep.mubr.f32.mxu0 %v2435_v22  ;;  %v1641_v0 = vld [vmem:[#allocation2 + $0x350] sm:$0xff] }
 0x1a8   : > { %v602_v5 = vsel %vm597_vm4, %v2769_v53, %v590_v40  ;;  %v603_v42 = vsel %vm597_vm4, %v590_v40, %v592_v12  ;;  %1154 = vrot.lane.b32.xlu1 %v3156_v37, %s3436_s9  ;;  %v1634_v53 = vld [vmem:[#allocation2 + $0x318] sm:$0xff]  ;;  %v2271_v56 = vpack.c.bf16 %v1641_v0, %v1633_v7 }
 0x1a9   : > { %618 = vst [vmem:[#allocation2 + $0xa0] sm:$0xf0] %v602_v5  ;;  %619 = vst [vmem:[#allocation2 + $0xa8] sm:$0xf0] %v603_v42  ;;  %1152 = vrot.lane.b32.xlu0 %v2977_v41, %s3436_s9 }
 0x1aa   : > { %v635_v6 = vpop.permute.xlu1 %634 }
 0x1ab   : > { %v633_v43 = vpop.permute.xlu0 %632 }
 0x1ac   : > { %v645_v44 = vsel %vm640_vm5, %v2778_v58, %v633_v43  ;;  %v646_v45 = vsel %vm640_vm5, %v633_v43, %v635_v6  ;;  %1198 = vrot.lane.b32.xlu1 %v3156_v37, %s3437_s12  ;;  %v1642_v48 = vld [vmem:[#allocation2 + $0x358] sm:$0xff] }
 0x1ad   : > { %661 = vst [vmem:[#allocation2 + $0xe0] sm:$0xf] %v645_v44  ;;  %662 = vst [vmem:[#allocation2 + $0xe8] sm:$0xf] %v646_v45  ;;  %1196 = vrot.lane.b32.xlu0 %v2564_v13, %s3437_s12  ;;  %v2269_v51 = vpack.c.bf16 %v1642_v48, %v1634_v53 }
 0x1ae   : > { %v678_v55 = vpop.permute.xlu1 %677 }
 0x1af   : > { %2270 = vmatprep.subr.bf16.mxu1 %v2269_v51  ;;  %v676_v58 = vpop.permute.xlu0 %675 }
 0x1b0   : > { %v688_v16 = vsel %vm683_vm6, %v2787_v15, %v676_v58  ;;  %v689_v18 = vsel %vm683_vm6, %v676_v58, %v678_v55  ;;  %2272 = vmatpush1.bf16.msra.mxu1 %v2271_v56  ;;  %1237 = vrot.lane.b32.xlu1 %v2514_v4, %s2431_s10  ;;  %v1556_v31 = vld [vmem:[#allocation2 + $0xa8] sm:$0xff]  ;;  %v1555_v36 = vld [vmem:[#allocation2 + $0xa0] sm:$0xff] }
 0x1b1   : > { %704 = vst [vmem:[#allocation2 + $0xe0] sm:$0xf0] %v688_v16  ;;  %705 = vst [vmem:[#allocation2 + $0xe8] sm:$0xf0] %v689_v18  ;;  %1235 = vrot.lane.b32.xlu0 %v2506_v2, %s2431_s10  ;;  %2302 = vmatprep.subr.bf16.mxu1 %v2301_v62 }
 0x1b2   : > { %v553_v23 = vpop.permute.xlu1 %552 }
 0x1b3   : > { %v551_v26 = vpop.permute.xlu0 %550  ;;  %2207 = vmatmul.mubr.msk.f32.vlgmr.msra.gmra.mrb[0].mxu1 %vm1653_vm15, %v3148_v35 }
 0x1b4   : > { %v561_v15 = vsel %vm554_vm3, %v3138_v30, %v551_v26  ;;  %v562_v27 = vsel %vm554_vm3, %v551_v26, %v553_v23  ;;  %2304 = vmatpush1.bf16.msra.mxu1 %v2303_v24  ;;  %1280 = vrot.lane.b32.xlu1 %v2514_v4, %s3438_s15  ;;  %vm3441_vm3 = vcmask 56320  }
 0x1b5   : > { %577 = vst [vmem:[#allocation2 + $0xb0] sm:$0xf] %v561_v15  ;;  %578 = vst [vmem:[#allocation2 + $0xb8] sm:$0xf] %v562_v27  ;;  %1278 = vrot.lane.b32.xlu0 %v2556_v11, %s3438_s15  ;;  %1934 = vmatprep.mubr.f32.mxu1 %v2435_v22 }
 0x1b6   : > { %v596_v28 = vpop.permute.xlu1 %595 }
 0x1b7   : > { %v594_v29 = vpop.permute.xlu0 %593 }
 0x1b8   : > { %v604_v32 = vsel %vm597_vm4, %v592_v12, %v594_v29  ;;  %v605_v30 = vsel %vm597_vm4, %v594_v29, %v596_v28  ;;  %1323 = vrot.lane.b32.xlu1 %v2514_v4, %s3439_s16  ;;  %v1564_v33 = vld [vmem:[#allocation2 + $0xe8] sm:$0xff]  ;;  %v1563_v38 = vld [vmem:[#allocation2 + $0xe0] sm:$0xff]  ;;  %vm3442_vm4 = vmmov %vm3441_vm3 }
 0x1b9   : > { %620 = vst [vmem:[#allocation2 + $0xb0] sm:$0xf0] %v604_v32  ;;  %621 = vst [vmem:[#allocation2 + $0xb8] sm:$0xf0] %v605_v30  ;;  %1321 = vrot.lane.b32.xlu0 %v2506_v2, %s3439_s16  ;;  %v2277_v39 = vpack.c.bf16 %v1564_v33, %v1556_v31  ;;  %v2279_v40 = vpack.c.bf16 %v1563_v38, %v1555_v36 }
 0x1ba   : > { %v639_v5 = vpop.permute.xlu1 %638 }
 0x1bb   : > { %v637_v42 = vpop.permute.xlu0 %636  ;;  %2278 = vmatprep.subr.bf16.mxu0 %v2277_v39 }
 0x1bc   : > { %v647_v12 = vsel %vm640_vm5, %v635_v6, %v637_v42  ;;  %v648_v43 = vsel %vm640_vm5, %v637_v42, %v639_v5  ;;  %2280 = vmatpush1.bf16.msra.mxu0 %v2279_v40  ;;  %1366 = vrot.lane.b32.xlu1 %v2514_v4, %s3440_s17  ;;  %vm3443_vm5 = vcmask 48128  }
 0x1bd   : > { %663 = vst [vmem:[#allocation2 + $0xf0] sm:$0xf] %v647_v12  ;;  %664 = vst [vmem:[#allocation2 + $0xf8] sm:$0xf] %v648_v43  ;;  %1364 = vrot.lane.b32.xlu0 %v2556_v11, %s3440_s17 }
 0x1be   : > { %v682_v0 = vpop.permute.xlu1 %681 }
 0x1bf   : > { %v680_v44 = vpop.permute.xlu0 %679 }
 0x1c0   : > { %v690_v45 = vsel %vm683_vm6, %v678_v55, %v680_v44  ;;  %v691_v53 = vsel %vm683_vm6, %v680_v44, %v682_v0  ;;  %1241 = vrot.lane.b32.xlu1 %v3156_v37, %s2431_s10  ;;  %v1558_v56 = vld [vmem:[#allocation2 + $0xb8] sm:$0xff]  ;;  %v1557_v62 = vld [vmem:[#allocation2 + $0xb0] sm:$0xff]  ;;  %vm3444_vm6 = vmmov %vm3443_vm5 }
 0x1c1   : > { %706 = vst [vmem:[#allocation2 + $0xf0] sm:$0xf0] %v690_v45  ;;  %707 = vst [vmem:[#allocation2 + $0xf8] sm:$0xf0] %v691_v53  ;;  %1239 = vrot.lane.b32.xlu0 %v2977_v41, %s2431_s10 }
 0x1c2   : > { %v721_v6 = vpop.permute.xlu1 %720 }
 0x1c3   : > { %v719_v48 = vpop.permute.xlu0 %718 }
 0x1c4   : > { %v731_v50 = vsel %vm726_vm7, %v2831_v49, %v719_v48  ;;  %v732_v51 = vsel %vm726_vm7, %v719_v48, %v721_v6  ;;  %1284 = vrot.lane.b32.xlu1 %v3156_v37, %s3438_s15 }
 0x1c5   : > { %747 = vst [vmem:[#allocation2 + $0x120] sm:$0xf] %v731_v50  ;;  %748 = vst [vmem:[#allocation2 + $0x128] sm:$0xf] %v732_v51  ;;  %1282 = vrot.lane.b32.xlu0 %v2564_v13, %s3438_s15 }
 0x1c6   : > { %v764_v7 = vpop.permute.xlu1 %763 }
 0x1c7   : > { %v762_v55 = vpop.permute.xlu0 %761 }
 0x1c8   : > { %v774_v59 = vsel %vm769_vm8, %v2840_v8, %v762_v55  ;;  %v775_v58 = vsel %vm769_vm8, %v762_v55, %v764_v7  ;;  %1327 = vrot.lane.b32.xlu1 %v3156_v37, %s3439_s16  ;;  %v1566_v49 = vld [vmem:[#allocation2 + $0xf8] sm:$0xff]  ;;  %v1565_v3 = vld [vmem:[#allocation2 + $0xf0] sm:$0xff] }
 0x1c9   : > { %790 = vst [vmem:[#allocation2 + $0x120] sm:$0xf0] %v774_v59  ;;  %791 = vst [vmem:[#allocation2 + $0x128] sm:$0xf0] %v775_v58  ;;  %1325 = vrot.lane.b32.xlu0 %v2977_v41, %s3439_s16  ;;  %v2305_v16 = vpack.c.bf16 %v1566_v49, %v1558_v56  ;;  %v2307_v18 = vpack.c.bf16 %v1565_v3, %v1557_v62  ;;  %v2439_v62 = vmov 0  }
 0x1ca   : > { %v807_v19 = vpop.permute.xlu1 %806  ;;  %2381 = vset.pattern.permute.xlu0 %v2439_v62 }
 0x1cb   : > { %2306 = vmatprep.subr.bf16.mxu1 %v2305_v16  ;;  %v805_v23 = vpop.permute.xlu0 %804 }
 0x1cc   : > { %v817_v8 = vsel %vm812_vm9, %v2850_v60, %v805_v23  ;;  %v818_v24 = vsel %vm812_vm9, %v805_v23, %v807_v19  ;;  %2308 = vmatpush1.bf16.msra.mxu1 %v2307_v18  ;;  %1370 = vrot.lane.b32.xlu1 %v3156_v37, %s3440_s17 }
 0x1cd   : > { %833 = vst [vmem:[#allocation2 + $0x160] sm:$0xf] %v817_v8  ;;  %834 = vst [vmem:[#allocation2 + $0x168] sm:$0xf] %v818_v24  ;;  %1368 = vrot.lane.b32.xlu0 %v2564_v13, %s3440_s17 }
 0x1ce   : > { %v850_v26 = vpop.permute.xlu1 %849 }
 0x1cf   : > { %v848_v15 = vpop.permute.xlu0 %847 }
 0x1d0   : > { %v860_v27 = vsel %vm855_vm10, %v2859_v14, %v848_v15  ;;  %v861_v28 = vsel %vm855_vm10, %v848_v15, %v850_v26  ;;  %1409 = vrot.lane.b32.xlu1 %v2514_v4, %s2436_s7  ;;  %v1572_v33 = vld [vmem:[#allocation2 + $0x128] sm:$0xff]  ;;  %v1571_v40 = vld [vmem:[#allocation2 + $0x120] sm:$0xff] }
 0x1d1   : > { %876 = vst [vmem:[#allocation2 + $0x160] sm:$0xf0] %v860_v27  ;;  %877 = vst [vmem:[#allocation2 + $0x168] sm:$0xf0] %v861_v28  ;;  %1407 = vrot.lane.b32.xlu0 %v2506_v2, %s2436_s7 }
 0x1d2   : > { %v725_v60 = vpop.permute.xlu1 %724 }
 0x1d3   : > { %v723_v29 = vpop.permute.xlu0 %722 }
 0x1d4   : > { %v733_v31 = vsel %vm726_vm7, %v721_v6, %v723_v29  ;;  %v734_v32 = vsel %vm726_vm7, %v723_v29, %v725_v60  ;;  %1452 = vrot.lane.b32.xlu1 %v2514_v4, %s2437_s8  ;;  %vm3445_vm7 = vcmask 457728  }
 0x1d5   : > { %749 = vst [vmem:[#allocation2 + $0x130] sm:$0xf] %v733_v31  ;;  %750 = vst [vmem:[#allocation2 + $0x138] sm:$0xf] %v734_v32  ;;  %1450 = vrot.lane.b32.xlu0 %v2556_v11, %s2437_s8 }
 0x1d6   : > { %v768_v14 = vpop.permute.xlu1 %767 }
 0x1d7   : > { %v766_v30 = vpop.permute.xlu0 %765 }
 0x1d8   : > { %v776_v36 = vsel %vm769_vm8, %v764_v7, %v766_v30  ;;  %v777_v38 = vsel %vm769_vm8, %v766_v30, %v768_v14  ;;  %1495 = vrot.lane.b32.xlu1 %v2514_v4, %s2438_s11  ;;  %v1580_v39 = vld [vmem:[#allocation2 + $0x168] sm:$0xff]  ;;  %v1579_v5 = vld [vmem:[#allocation2 + $0x160] sm:$0xff]  ;;  %vm3446_vm8 = vmmov %vm3445_vm7 }
 0x1d9   : > { %792 = vst [vmem:[#allocation2 + $0x130] sm:$0xf0] %v776_v36  ;;  %793 = vst [vmem:[#allocation2 + $0x138] sm:$0xf0] %v777_v38  ;;  %1493 = vrot.lane.b32.xlu0 %v2506_v2, %s2438_s11  ;;  %v2281_v42 = vpack.c.bf16 %v1580_v39, %v1572_v33  ;;  %v2283_v11 = vpack.c.bf16 %v1579_v5, %v1571_v40 }
 0x1da   : > { %v811_v12 = vpop.permute.xlu1 %810 }
 0x1db   : > { %v809_v43 = vpop.permute.xlu0 %808  ;;  %2282 = vmatprep.subr.bf16.mxu0 %v2281_v42 }
 0x1dc   : > { %v819_v0 = vsel %vm812_vm9, %v807_v19, %v809_v43  ;;  %v820_v44 = vsel %vm812_vm9, %v809_v43, %v811_v12  ;;  %2284 = vmatpush1.bf16.msra.mxu0 %v2283_v11  ;;  %1413 = vrot.lane.b32.xlu1 %v3156_v37, %s2436_s7  ;;  %vm3447_vm9 = vcmask 449536  }
 0x1dd   : > { %835 = vst [vmem:[#allocation2 + $0x170] sm:$0xf] %v819_v0  ;;  %836 = vst [vmem:[#allocation2 + $0x178] sm:$0xf] %v820_v44  ;;  %1411 = vrot.lane.b32.xlu0 %v2977_v41, %s2436_s7 }
 0x1de   : > { %v854_v4 = vpop.permute.xlu1 %853 }
 0x1df   : > { %v852_v2 = vpop.permute.xlu0 %851 }
 0x1e0   : > { %v862_v45 = vsel %vm855_vm10, %v850_v26, %v852_v2  ;;  %v863_v53 = vsel %vm855_vm10, %v852_v2, %v854_v4  ;;  %1456 = vrot.lane.b32.xlu1 %v3156_v37, %s2437_s8  ;;  %v1574_v56 = vld [vmem:[#allocation2 + $0x138] sm:$0xff]  ;;  %v1573_v49 = vld [vmem:[#allocation2 + $0x130] sm:$0xff]  ;;  %vm3448_vm10 = vmmov %vm3447_vm9 }
 0x1e1   : > { %878 = vst [vmem:[#allocation2 + $0x170] sm:$0xf0] %v862_v45  ;;  %879 = vst [vmem:[#allocation2 + $0x178] sm:$0xf0] %v863_v53  ;;  %1454 = vrot.lane.b32.xlu0 %v2564_v13, %s2437_s8  ;;  %v1647_v13 = vld [vmem:[%s3412_s1] sm:$0xff]  ;;  %s370_s8 = scalar_lea.vmem %s3417_s6, %s2205_s25 }
 0x1e2   : > { %v893_v6 = vpop.permute.xlu1 %892 }
 0x1e3   : > { %v891_v48 = vpop.permute.xlu0 %890 }
 0x1e4   : > { %v903_v50 = vsel %vm898_vm11, %v2916_v47, %v891_v48  ;;  %v904_v51 = vsel %vm898_vm11, %v891_v48, %v893_v6  ;;  %1499 = vrot.lane.b32.xlu1 %v3156_v37, %s2438_s11 }
 0x1e5   : > { %919 = vst [vmem:[#allocation2 + $0x1a0] sm:$0xf] %v903_v50  ;;  %920 = vst [vmem:[#allocation2 + $0x1a8] sm:$0xf] %v904_v51  ;;  %1497 = vrot.lane.b32.xlu0 %v2977_v41, %s2438_s11 }
 0x1e6   : > { %v936_v7 = vpop.permute.xlu1 %935 }
 0x1e7   : > { %v934_v55 = vpop.permute.xlu0 %933 }
 0x1e8   : > { %v946_v47 = vsel %vm941_vm12, %v2926_v9, %v934_v55  ;;  %v947_v59 = vsel %vm941_vm12, %v934_v55, %v936_v7  ;;  %v1582_v58 = vld [vmem:[#allocation2 + $0x178] sm:$0xff]  ;;  %v1581_v37 = vld [vmem:[#allocation2 + $0x170] sm:$0xff] }
 0x1e9   : > { %962 = vst [vmem:[#allocation2 + $0x1a0] sm:$0xf0] %v946_v47  ;;  %963 = vst [vmem:[#allocation2 + $0x1a8] sm:$0xf0] %v947_v59  ;;  %v2309_v41 = vpack.c.bf16 %v1582_v58, %v1574_v56  ;;  %v2311_v3 = vpack.c.bf16 %v1581_v37, %v1573_v49  ;;  %1650 = vperm.xlu0 %2381, %v1647_v13  }
 0x1ea   : > { %v979_v16 = vpop.permute.xlu1 %978 }
 0x1eb   : > { %2310 = vmatprep.subr.bf16.mxu1 %v2309_v41  ;;  %v977_v18 = vpop.permute.xlu0 %976 }
 0x1ec   : > { %v989_v19 = vsel %vm984_vm13, %v2936_v57, %v977_v18  ;;  %v990_v9 = vsel %vm984_vm13, %v977_v18, %v979_v16  ;;  %2312 = vmatpush1.bf16.msra.mxu1 %v2311_v3 }
 0x1ed   : > { %1005 = vst [vmem:[#allocation2 + $0x1e0] sm:$0xf] %v989_v19  ;;  %1006 = vst [vmem:[#allocation2 + $0x1e8] sm:$0xf] %v990_v9 }
 0x1ee   : > { %v1022_v23 = vpop.permute.xlu1 %1021 }
 0x1ef   : > { %v1020_v8 = vpop.permute.xlu0 %1019 }
 0x1f0   : > { %v1032_v24 = vsel %vm1027_vm14, %v2945_v1, %v1020_v8  ;;  %v1033_v26 = vsel %vm1027_vm14, %v1020_v8, %v1022_v23  ;;  %v1588_v31 = vld [vmem:[#allocation2 + $0x1a8] sm:$0xff]  ;;  %v1587_v30 = vld [vmem:[#allocation2 + $0x1a0] sm:$0xff] }
 0x1f1   : > { %1048 = vst [vmem:[#allocation2 + $0x1e0] sm:$0xf0] %v1032_v24  ;;  %1049 = vst [vmem:[#allocation2 + $0x1e8] sm:$0xf0] %v1033_v26 }
 0x1f2   : > { %v897_v15 = vpop.permute.xlu1 %896 }
 0x1f3   : > { %v895_v27 = vpop.permute.xlu0 %894 }
 0x1f4   : > { %v905_v28 = vsel %vm898_vm11, %v893_v6, %v895_v27  ;;  %v906_v57 = vsel %vm898_vm11, %v895_v27, %v897_v15  ;;  %vm3449_vm11 = vmmov %vm3441_vm3 }
 0x1f5   : > { %921 = vst [vmem:[#allocation2 + $0x1b0] sm:$0xf] %v905_v28  ;;  %922 = vst [vmem:[#allocation2 + $0x1b8] sm:$0xf] %v906_v57 }
 0x1f6   : > { %v940_v60 = vpop.permute.xlu1 %939 }
 0x1f7   : > { %v938_v29 = vpop.permute.xlu0 %937 }
 0x1f8   : > { %v948_v32 = vsel %vm941_vm12, %v936_v7, %v938_v29  ;;  %v949_v14 = vsel %vm941_vm12, %v938_v29, %v940_v60  ;;  %v1596_v1 = vld [vmem:[#allocation2 + $0x1e8] sm:$0xff]  ;;  %v1595_v33 = vld [vmem:[#allocation2 + $0x1e0] sm:$0xff]  ;;  %vm3450_vm12 = vmmov %vm3441_vm3 }
 0x1f9   : > { %964 = vst [vmem:[#allocation2 + $0x1b0] sm:$0xf0] %v948_v32  ;;  %965 = vst [vmem:[#allocation2 + $0x1b8] sm:$0xf0] %v949_v14  ;;  %v2285_v36 = vpack.c.bf16 %v1596_v1, %v1588_v31  ;;  %v2287_v38 = vpack.c.bf16 %v1595_v33, %v1587_v30 }
 0x1fa   : > { %v983_v39 = vpop.permute.xlu1 %982 }
 0x1fb   : > { %v981_v40 = vpop.permute.xlu0 %980  ;;  %2286 = vmatprep.subr.bf16.mxu0 %v2285_v36 }
 0x1fc   : > { %v991_v5 = vsel %vm984_vm13, %v979_v16, %v981_v40  ;;  %v992_v42 = vsel %vm984_vm13, %v981_v40, %v983_v39  ;;  %2288 = vmatpush1.bf16.msra.mxu0 %v2287_v38  ;;  %vm3451_vm13 = vmmov %vm3443_vm5 }
 0x1fd   : > { %1007 = vst [vmem:[#allocation2 + $0x1f0] sm:$0xf] %v991_v5  ;;  %1008 = vst [vmem:[#allocation2 + $0x1f8] sm:$0xf] %v992_v42 }
 0x1fe   : > { %v1026_v11 = vpop.permute.xlu1 %1025 }
 0x1ff   : > { %v1024_v12 = vpop.permute.xlu0 %1023 }
 0x200   : > { %v1034_v43 = vsel %vm1027_vm14, %v1022_v23, %v1024_v12  ;;  %v1035_v0 = vsel %vm1027_vm14, %v1024_v12, %v1026_v11  ;;  %v1590_v48 = vld [vmem:[#allocation2 + $0x1b8] sm:$0xff]  ;;  %v1589_v55 = vld [vmem:[#allocation2 + $0x1b0] sm:$0xff]  ;;  %vm3452_vm14 = vmmov %vm3443_vm5 }
 0x201   : > { %1050 = vst [vmem:[#allocation2 + $0x1f0] sm:$0xf0] %v1034_v43  ;;  %1051 = vst [vmem:[#allocation2 + $0x1f8] sm:$0xf0] %v1035_v0 }
 0x202   : > { %v1065_v44 = vpop.permute.xlu1 %1064 }
 0x203   : > { %v1063_v4 = vpop.permute.xlu0 %1062 }
 0x204   : > { %v1075_v2 = vsel %vm3441_vm3, %v2989_v46, %v1063_v4  ;;  %v1076_v45 = vsel %vm3442_vm4, %v1063_v4, %v1065_v44  ;;  %vm3453_vm3 = vmmov %vm3445_vm7 }
 0x205   : > { %1091 = vst [vmem:[#allocation2 + $0x220] sm:$0xf] %v1075_v2  ;;  %1092 = vst [vmem:[#allocation2 + $0x228] sm:$0xf] %v1076_v45 }
 0x206   : > { %v1108_v53 = vpop.permute.xlu1 %1107  ;;  %vm3454_vm4 = vmmov %vm3453_vm3 }
 0x207   : > { %v1106_v6 = vpop.permute.xlu0 %1105 }
 0x208   : > { %v1118_v50 = vsel %vm3443_vm5, %v2998_v52, %v1106_v6  ;;  %v1119_v51 = vsel %vm3444_vm6, %v1106_v6, %v1108_v53  ;;  %v1598_v7 = vld [vmem:[#allocation2 + $0x1f8] sm:$0xff]  ;;  %v1597_v56 = vld [vmem:[#allocation2 + $0x1f0] sm:$0xff]  ;;  %vm3455_vm5 = vmmov %vm3447_vm9 }
 0x209   : > { %1134 = vst [vmem:[#allocation2 + $0x220] sm:$0xf0] %v1118_v50  ;;  %1135 = vst [vmem:[#allocation2 + $0x228] sm:$0xf0] %v1119_v51  ;;  %v2313_v13 = vpack.c.bf16 %v1598_v7, %v1590_v48  ;;  %v2315_v47 = vpack.c.bf16 %v1597_v56, %v1589_v55 }
 0x20a   : > { %v1151_v46 = vpop.permute.xlu1 %1150  ;;  %vm3456_vm6 = vmmov %vm3455_vm5 }
 0x20b   : > { %2314 = vmatprep.subr.bf16.mxu1 %v2313_v13  ;;  %v1149_v59 = vpop.permute.xlu0 %1148 }
 0x20c   : > { %v1161_v58 = vsel %vm3445_vm7, %v3007_v61, %v1149_v59  ;;  %v1162_v49 = vsel %vm3446_vm8, %v1149_v59, %v1151_v46  ;;  %2316 = vmatpush1.bf16.msra.mxu1 %v2315_v47  ;;  %vm3457_vm7 = vcmask 375808  }
 0x20d   : > { %1177 = vst [vmem:[#allocation2 + $0x260] sm:$0xf] %v1161_v58  ;;  %1178 = vst [vmem:[#allocation2 + $0x268] sm:$0xf] %v1162_v49 }
 0x20e   : > { %v1195_v52 = vpop.permute.xlu1 %1194  ;;  %vm3458_vm8 = vmmov %vm3457_vm7 }
 0x20f   : > { %v1193_v37 = vpop.permute.xlu0 %1192 }
 0x210   : > { %v1205_v62 = vsel %vm3447_vm9, %v3016_v17, %v1193_v37  ;;  %v1206_v41 = vsel %vm3448_vm10, %v1193_v37, %v1195_v52  ;;  %v1604_v23 = vld [vmem:[#allocation2 + $0x228] sm:$0xff]  ;;  %v1603_v26 = vld [vmem:[#allocation2 + $0x220] sm:$0xff]  ;;  %vm3459_vm9 = vcmask 367616  }
 0x211   : > { %1221 = vst [vmem:[#allocation2 + $0x260] sm:$0xf0] %v1205_v62  ;;  %1222 = vst [vmem:[#allocation2 + $0x268] sm:$0xf0] %v1206_v41 }
 0x212   : > { %v1069_v3 = vpop.permute.xlu1 %1068  ;;  %vm3460_vm10 = vmmov %vm3459_vm9 }
 0x213   : > { %v1067_v16 = vpop.permute.xlu0 %1066 }
 0x214   : > { %v1077_v18 = vsel %vm3449_vm11, %v1065_v44, %v1067_v16  ;;  %v1078_v61 = vsel %vm3450_vm12, %v1067_v16, %v1069_v3  ;;  %vm3461_vm11 = vcmask 359424  }
 0x215   : > { %1093 = vst [vmem:[#allocation2 + $0x230] sm:$0xf] %v1077_v18  ;;  %1094 = vst [vmem:[#allocation2 + $0x238] sm:$0xf] %v1078_v61 }
 0x216   : > { %v1112_v19 = vpop.permute.xlu1 %1111  ;;  %vm3462_vm12 = vmmov %vm3461_vm11 }
 0x217   : > { %v1110_v9 = vpop.permute.xlu0 %1109 }
 0x218   : > { %v1120_v8 = vsel %vm3451_vm13, %v1108_v53, %v1110_v9  ;;  %v1121_v24 = vsel %vm3452_vm14, %v1110_v9, %v1112_v19  ;;  %v1612_v17 = vld [vmem:[#allocation2 + $0x268] sm:$0xff]  ;;  %v1611_v15 = vld [vmem:[#allocation2 + $0x260] sm:$0xff]  ;;  %vm3463_vm13 = vmmov %vm3457_vm7 }
 0x219   : > { %1136 = vst [vmem:[#allocation2 + $0x230] sm:$0xf0] %v1120_v8  ;;  %1137 = vst [vmem:[#allocation2 + $0x238] sm:$0xf0] %v1121_v24  ;;  %v2289_v27 = vpack.c.bf16 %v1612_v17, %v1604_v23  ;;  %v2291_v28 = vpack.c.bf16 %v1611_v15, %v1603_v26 }
 0x21a   : > { %v1155_v57 = vpop.permute.xlu1 %1154  ;;  %vm3464_vm14 = vmmov %vm3457_vm7 }
 0x21b   : > { %v1153_v60 = vpop.permute.xlu0 %1152  ;;  %2290 = vmatprep.subr.bf16.mxu0 %v2289_v27 }
 0x21c   : > { %v1163_v29 = vsel %vm3453_vm3, %v1151_v46, %v1153_v60  ;;  %v1164_v31 = vsel %vm3454_vm4, %v1153_v60, %v1155_v57  ;;  %2292 = vmatpush1.bf16.msra.mxu0 %v2291_v28  ;;  %vm3467_vm4 = vmmov %vm3461_vm11 }
 0x21d   : > { %1179 = vst [vmem:[#allocation2 + $0x270] sm:$0xf] %v1163_v29  ;;  %1180 = vst [vmem:[#allocation2 + $0x278] sm:$0xf] %v1164_v31 }
 0x21e   : > { %v1199_v32 = vpop.permute.xlu1 %1198 }
 0x21f   : > { %v1197_v14 = vpop.permute.xlu0 %1196 }
 0x220   : > { %v1207_v1 = vsel %vm3455_vm5, %v1195_v52, %v1197_v14  ;;  %v1208_v30 = vsel %vm3456_vm6, %v1197_v14, %v1199_v32  ;;  %v1606_v42 = vld [vmem:[#allocation2 + $0x238] sm:$0xff]  ;;  %v1605_v0 = vld [vmem:[#allocation2 + $0x230] sm:$0xff]  ;;  %vm3468_vm5 = vmmov %vm3467_vm4  ;;  %vm3469_vm6 = vcmask 285696  }
 0x221   : > { %1223 = vst [vmem:[#allocation2 + $0x270] sm:$0xf0] %v1207_v1  ;;  %1224 = vst [vmem:[#allocation2 + $0x278] sm:$0xf0] %v1208_v30 }
 0x222   : > { %v1238_v33 = vpop.permute.xlu1 %1237 }
 0x223   : > { %v1236_v36 = vpop.permute.xlu0 %1235 }
 0x224   : > { %v1248_v38 = vsel %vm1243_vm1, %v3057_v54, %v1236_v36  ;;  %v1249_v39 = vsel %vm1243_vm1, %v1236_v36, %v1238_v33 }
 0x225   : > { %1264 = vst [vmem:[#allocation2 + $0x2a0] sm:$0xf] %v1248_v38  ;;  %1265 = vst [vmem:[#allocation2 + $0x2a8] sm:$0xf] %v1249_v39 }
 0x226   : > { %v1281_v40 = vpop.permute.xlu1 %1280 }
 0x227   : > { %v1279_v5 = vpop.permute.xlu0 %1278 }
 0x228   : > { %v1291_v11 = vsel %vm3457_vm7, %v3066_v10, %v1279_v5  ;;  %v1292_v12 = vsel %vm3458_vm8, %v1279_v5, %v1281_v40  ;;  %v1614_v43 = vld [vmem:[#allocation2 + $0x278] sm:$0xff]  ;;  %v1613_v44 = vld [vmem:[#allocation2 + $0x270] sm:$0xff]  ;;  %vm3470_vm7 = vmmov %vm3469_vm6 }
 0x229   : > { %1307 = vst [vmem:[#allocation2 + $0x2a0] sm:$0xf0] %v1291_v11  ;;  %1308 = vst [vmem:[#allocation2 + $0x2a8] sm:$0xf0] %v1292_v12  ;;  %v2317_v4 = vpack.c.bf16 %v1614_v43, %v1606_v42  ;;  %v2319_v2 = vpack.c.bf16 %v1613_v44, %v1605_v0 }
 0x22a   : > { %v1324_v54 = vpop.permute.xlu1 %1323  ;;  %vm3471_vm8 = vmmov %vm3469_vm6 }
 0x22b   : > { %2318 = vmatprep.subr.bf16.mxu1 %v2317_v4  ;;  %v1322_v45 = vpop.permute.xlu0 %1321 }
 0x22c   : > { %v1334_v53 = vsel %vm3459_vm9, %v3075_v20, %v1322_v45  ;;  %v1335_v6 = vsel %vm3460_vm10, %v1322_v45, %v1324_v54  ;;  %2320 = vmatpush1.bf16.msra.mxu1 %v2319_v2 }
 0x22d   : > { %1350 = vst [vmem:[#allocation2 + $0x2e0] sm:$0xf] %v1334_v53  ;;  %1351 = vst [vmem:[#allocation2 + $0x2e8] sm:$0xf] %v1335_v6 }
 0x22e   : > { %v1367_v10 = vpop.permute.xlu1 %1366 }
 0x22f   : > { %v1365_v48 = vpop.permute.xlu0 %1364 }
 0x230   : > { %v1377_v50 = vsel %vm3461_vm11, %v3084_v25, %v1365_v48  ;;  %v1378_v51 = vsel %vm3462_vm12, %v1365_v48, %v1367_v10  ;;  %v1620_v46 = vld [vmem:[#allocation2 + $0x2a8] sm:$0xff]  ;;  %v1619_v49 = vld [vmem:[#allocation2 + $0x2a0] sm:$0xff] }
 0x231   : > { %1393 = vst [vmem:[#allocation2 + $0x2e0] sm:$0xf0] %v1377_v50  ;;  %1394 = vst [vmem:[#allocation2 + $0x2e8] sm:$0xf0] %v1378_v51 }
 0x232   : > { %v1242_v7 = vpop.permute.xlu1 %1241 }
 0x233   : > { %v1240_v55 = vpop.permute.xlu0 %1239 }
 0x234   : > { %v1250_v56 = vsel %vm1243_vm1, %v1238_v33, %v1240_v55  ;;  %v1251_v20 = vsel %vm1243_vm1, %v1240_v55, %v1242_v7  ;;  %vm3465_vm1 = vmmov %vm3459_vm9 }
 0x235   : > { %1266 = vst [vmem:[#allocation2 + $0x2b0] sm:$0xf] %v1250_v56  ;;  %1267 = vst [vmem:[#allocation2 + $0x2b8] sm:$0xf] %v1251_v20  ;;  %v1959_v56 = vlaneseq }
 0x236   : > { %v1285_v13 = vpop.permute.xlu1 %1284  ;;  %vm3466_vm3 = vmmov %vm3465_vm1 }
 0x237   : > { %v1283_v47 = vpop.permute.xlu0 %1282  ;;  %vm3472_vm9 = vmmov %vm3469_vm6  ;;  %v3350_v20 = vshrl.u32 %v1959_v56, 7 }
 0x238   : > { %v1293_v59 = vsel %vm3463_vm13, %v1281_v40, %v1283_v47  ;;  %v1294_v58 = vsel %vm3464_vm14, %v1283_v47, %v1285_v13  ;;  %v1628_v25 = vld [vmem:[#allocation2 + $0x2e8] sm:$0xff]  ;;  %v1627_v52 = vld [vmem:[#allocation2 + $0x2e0] sm:$0xff] }
 0x239   : > { %1309 = vst [vmem:[#allocation2 + $0x2b0] sm:$0xf0] %v1293_v59  ;;  %1310 = vst [vmem:[#allocation2 + $0x2b8] sm:$0xf0] %v1294_v58  ;;  %v2293_v37 = vpack.c.bf16 %v1628_v25, %v1620_v46  ;;  %v2295_v62 = vpack.c.bf16 %v1627_v52, %v1619_v49  ;;  %v1961_v13 = vsub.s32 0, %v3350_v20  ;;  %v3358_v46 = vld [vmem:[%s3413_s2] sm:$0xff] }
 0x23a   : > { %v1328_v41 = vpop.permute.xlu1 %1327  ;;  %v1965_v59 = vsub.s32 1, %v3350_v20 }
 0x23b   : > { %v1326_v3 = vpop.permute.xlu0 %1325  ;;  %2294 = vmatprep.subr.bf16.mxu0 %v2293_v37 }
 0x23c   : > { %v1336_v16 = vsel %vm3465_vm1, %v1324_v54, %v1326_v3  ;;  %v1337_v18 = vsel %vm3466_vm3, %v1326_v3, %v1328_v41  ;;  %2296 = vmatpush1.bf16.msra.mxu0 %v2295_v62  ;;  %v1966_v37 = vrot.slane %v3358_v46, %v1965_v59 }
 0x23d   : > { %1352 = vst [vmem:[#allocation2 + $0x2f0] sm:$0xf] %v1336_v16  ;;  %1353 = vst [vmem:[#allocation2 + $0x2f8] sm:$0xf] %v1337_v18 }
 0x23e   : > { %v1371_v61 = vpop.permute.xlu1 %1370 }
 0x23f   : > { %v1369_v19 = vpop.permute.xlu0 %1368 }
 0x240   : > { %v1379_v9 = vsel %vm3467_vm4, %v1367_v10, %v1369_v19  ;;  %v1380_v23 = vsel %vm3468_vm5, %v1369_v19, %v1371_v61  ;;  %v1622_v28 = vld [vmem:[#allocation2 + $0x2b8] sm:$0xff]  ;;  %v1621_v31 = vld [vmem:[#allocation2 + $0x2b0] sm:$0xff] }
 0x241   : > { %1395 = vst [vmem:[#allocation2 + $0x2f0] sm:$0xf0] %v1379_v9  ;;  %1396 = vst [vmem:[#allocation2 + $0x2f8] sm:$0xf0] %v1380_v23  ;;  %v1969_v23 = vsub.s32 2, %v3350_v20 }
 0x242   : > { %v1410_v8 = vpop.permute.xlu1 %1409 }
 0x243   : > { %v1408_v24 = vpop.permute.xlu0 %1407 }
 0x244   : > { %v1420_v17 = vsel %vm1415_vm0, %v3121_v63, %v1408_v24  ;;  %v1421_v26 = vsel %vm1415_vm0, %v1408_v24, %v1410_v8 }
 0x245   : > { %1436 = vst [vmem:[#allocation2 + $0x320] sm:$0xf] %v1420_v17  ;;  %1437 = vst [vmem:[#allocation2 + $0x328] sm:$0xf] %v1421_v26  ;;  %v1970_v26 = vrot.slane %v3358_v46, %v1969_v23 }
 0x246   : > { %v1453_v15 = vpop.permute.xlu1 %1452 }
 0x247   : > { %v1451_v27 = vpop.permute.xlu0 %1450 }
 0x248   : > { %v1463_v57 = vsel %vm3469_vm6, %v3130_v21, %v1451_v27  ;;  %v1464_v60 = vsel %vm3470_vm7, %v1451_v27, %v1453_v15  ;;  %v1630_v29 = vld [vmem:[#allocation2 + $0x2f8] sm:$0xff]  ;;  %v1629_v32 = vld [vmem:[#allocation2 + $0x2f0] sm:$0xff] }
 0x249   : > { %1479 = vst [vmem:[#allocation2 + $0x320] sm:$0xf0] %v1463_v57  ;;  %1480 = vst [vmem:[#allocation2 + $0x328] sm:$0xf0] %v1464_v60  ;;  %v2321_v14 = vpack.c.bf16 %v1630_v29, %v1622_v28  ;;  %v2323_v1 = vpack.c.bf16 %v1629_v32, %v1621_v31 }
 0x24a   : > { %v1496_v63 = vpop.permute.xlu1 %1495 }
 0x24b   : > { %2322 = vmatprep.subr.bf16.mxu1 %v2321_v14  ;;  %v1494_v30 = vpop.permute.xlu0 %1493 }
 0x24c   : > { %v1506_v33 = vsel %vm1501_vm2, %v3143_v34, %v1494_v30  ;;  %v1507_v36 = vsel %vm1501_vm2, %v1494_v30, %v1496_v63  ;;  %2324 = vmatpush1.bf16.msra.mxu1 %v2323_v1 }
 0x24d   : > { %1522 = vst [vmem:[#allocation2 + $0x360] sm:$0xf] %v1506_v33  ;;  %1523 = vst [vmem:[#allocation2 + $0x368] sm:$0xf] %v1507_v36  ;;  %v1977_v36 = vsub.s32 4, %v3350_v20 }
 0x24e   : > { %v1414_v21 = vpop.permute.xlu1 %1413 }
 0x24f   : > { %v1412_v38 = vpop.permute.xlu0 %1411 }
 0x250   : > { %v1422_v39 = vsel %vm1415_vm0, %v1410_v8, %v1412_v38  ;;  %v1423_v40 = vsel %vm1415_vm0, %v1412_v38, %v1414_v21  ;;  %v1636_v11 = vld [vmem:[#allocation2 + $0x328] sm:$0xff]  ;;  %v1635_v0 = vld [vmem:[#allocation2 + $0x320] sm:$0xff]  ;;  %v1973_v8 = vsub.s32 3, %v3350_v20  ;;  %v1981_v21 = vsub.s32 5, %v3350_v20 }
 0x251   : > { %1438 = vst [vmem:[#allocation2 + $0x330] sm:$0xf] %v1422_v39  ;;  %1439 = vst [vmem:[#allocation2 + $0x338] sm:$0xf] %v1423_v40  ;;  %v1978_v40 = vrot.slane %v3358_v46, %v1977_v36  ;;  %vm2033_vm0 = vcmask 7168  }
 0x252   : > { %v1457_v5 = vpop.permute.xlu1 %1456  ;;  %v1974_v28 = vrot.slane %v3358_v46, %v1973_v8 }
 0x253   : > { %v1455_v42 = vpop.permute.xlu0 %1454 }
 0x254   : > { %v1465_v12 = vsel %vm3471_vm8, %v1453_v15, %v1455_v42  ;;  %v1466_v34 = vsel %vm3472_vm9, %v1455_v42, %v1457_v5  ;;  %v1644_v43 = vld [vmem:[#allocation2 + $0x368] sm:$0xff]  ;;  %v1643_v44 = vld [vmem:[#allocation2 + $0x360] sm:$0xff] }
 0x255   : > { %1481 = vst [vmem:[#allocation2 + $0x330] sm:$0xf0] %v1465_v12  ;;  %1482 = vst [vmem:[#allocation2 + $0x338] sm:$0xf0] %v1466_v34  ;;  %v2297_v4 = vpack.c.bf16 %v1644_v43, %v1636_v11  ;;  %v2299_v2 = vpack.c.bf16 %v1643_v44, %v1635_v0  ;;  %v1982_v11 = vrot.slane %v3358_v46, %v1981_v21 }
 0x256   : > { %v1500_v54 = vpop.permute.xlu1 %1499 }
 0x257   : > { %v1498_v45 = vpop.permute.xlu0 %1497  ;;  %2298 = vmatprep.subr.bf16.mxu0 %v2297_v4 }
 0x258   : > { %v1508_v53 = vsel %vm1501_vm2, %v1496_v63, %v1498_v45  ;;  %v1509_v6 = vsel %vm1501_vm2, %v1498_v45, %v1500_v54  ;;  %2300 = vmatpush1.bf16.msra.mxu0 %v2299_v2 }
 0x259   : > { %1524 = vst [vmem:[#allocation2 + $0x370] sm:$0xf] %v1508_v53  ;;  %1525 = vst [vmem:[#allocation2 + $0x378] sm:$0xf] %v1509_v6  ;;  %v1985_v53 = vsub.s32 6, %v3350_v20  ;;  %v1989_v6 = vsub.s32 7, %v3350_v20 }
 0x25b   : > { %2208 = vmatmul.mubr.msk.f32.vlgmr.msra.gmra.mrb[2].mxu0 %vm1653_vm15, %v3148_v35  ;;  %v1990_v56 = vrot.slane %v3358_v46, %v1989_v6 }
 0x25c   : > { %v1638_v10 = vld [vmem:[#allocation2 + $0x338] sm:$0xff]  ;;  %v1637_v50 = vld [vmem:[#allocation2 + $0x330] sm:$0xff] }
 0x260   : > { %v1646_v48 = vld [vmem:[#allocation2 + $0x378] sm:$0xff]  ;;  %v1645_v51 = vld [vmem:[#allocation2 + $0x370] sm:$0xff] }
 0x261   : > { %v2325_v7 = vpack.c.bf16 %v1646_v48, %v1638_v10  ;;  %v2327_v55 = vpack.c.bf16 %v1645_v51, %v1637_v50  ;;  %v1986_v51 = vrot.slane %v3358_v46, %v1985_v53 }
 0x263   : > { %2326 = vmatprep.subr.bf16.mxu1 %v2325_v7 }
 0x264   : > { %2328 = vmatpush1.bf16.msra.mxu1 %v2327_v55 }
 0x267   : > { %2209 = vmatmul.mubr.msk.f32.vlgmr.msra.gmra.mrb[2].mxu1 %vm1653_vm15, %v3148_v35  ;;  %v1962_v35 = vrot.slane %v3358_v46, %v1961_v13  ;;  %vm2039_vm15 = vcmask 15360  }
 0x268   : > { %v3353_v47 = vpop.permute.xlu0 %1650  ;;  %2040 = vst.msk [vmem:[%s370_s8] sm:$0xff] %vm2039_vm15, %v2435_v22 }
 0x279   : > { %v1723_v58 = vpop.f32.mrb[0].mxu0 }
 0x27a   : > { %v1724_v25 = vadd.f32 %v1723_v58, %v3353_v47  ;;  %v1725_v49 = vpop.f32.mrb[1].mxu0 }
 0x27b   : > { %v1726_v52 = vadd.f32 %v1725_v49, %v3353_v47 }
 0x27c   : > { %v1941_v62 = vmax.f32 %v1724_v25, 0.0 }
 0x27d   : > { %v1942_v41 = vmax.f32 %v1726_v52, 0.0 }
 0x27e   : > { %1949 = vst [vmem:[%s3367_s29] sm:$0xff] %v1941_v62  ;;  %v1999_v3 = vmul.f32 %v1962_v35, %v1941_v62 }
 0x27f   : > { %1950 = vst [vmem:[%s3367_s29 + $0x8] sm:$0xff] %v1942_v41  ;;  %v2000_v16 = vmul.f32 %v1966_v37, %v1942_v41 }
 0x280   : > { %v2016_v18 = vmul.f32 %v1999_v3, %v1941_v62 }
 0x281   : > { %v2007_v61 = vadd.f32 %v2000_v16, %v1999_v3  ;;  %v2017_v19 = vmul.f32 %v2000_v16, %v1942_v41 }
 0x283   : > { %v2024_v9 = vadd.f32 %v2017_v19, %v2016_v18 }
 0x286   : > { %v1794_v24 = vpop.f32.mrb[0].mxu1 }
 0x287   : > { %v1795_v17 = vadd.f32 %v1794_v24, %v3353_v47  ;;  %v1796_v15 = vpop.f32.mrb[1].mxu1 }
 0x288   : > { %v1797_v27 = vadd.f32 %v1796_v15, %v3353_v47 }
 0x289   : > { %v1943_v57 = vmax.f32 %v1795_v17, 0.0 }
 0x28a   : > { %v1944_v60 = vmax.f32 %v1797_v27, 0.0 }
 0x28b   : > { %1951 = vst [vmem:[%s3367_s29 + $0x10] sm:$0xff] %v1943_v57  ;;  %v2001_v29 = vmul.f32 %v1970_v26, %v1943_v57 }
 0x28c   : > { %1952 = vst [vmem:[%s3367_s29 + $0x18] sm:$0xff] %v1944_v60  ;;  %v2002_v31 = vmul.f32 %v1974_v28, %v1944_v60 }
 0x28d   : > { %v2008_v32 = vadd.f32 %v2007_v61, %v2001_v29  ;;  %v2018_v14 = vmul.f32 %v2001_v29, %v1943_v57 }
 0x28e   : > { %v2019_v1 = vmul.f32 %v2002_v31, %v1944_v60 }
 0x28f   : > { %v2025_v63 = vadd.f32 %v2024_v9, %v2018_v14  ;;  %v2009_v30 = vadd.f32 %v2008_v32, %v2002_v31 }
 0x291   : > { %v2026_v33 = vadd.f32 %v2025_v63, %v2019_v1 }
 0x32e   : > { %v1865_v38 = vpop.f32.mrb[2].mxu0 }
 0x32f   : > { %v1866_v39 = vadd.f32 %v1865_v38, %v3353_v47  ;;  %v1867_v5 = vpop.f32.mrb[3].mxu0 }
 0x330   : > { %v1868_v42 = vadd.f32 %v1867_v5, %v3353_v47 }
 0x331   : > { %v1945_v12 = vmax.f32 %v1866_v39, 0.0 }
 0x332   : > { %v1946_v34 = vmax.f32 %v1868_v42, 0.0 }
 0x333   : > { %1953 = vst [vmem:[%s3367_s29 + $0x20] sm:$0xff] %v1945_v12  ;;  %v2003_v43 = vmul.f32 %v1978_v40, %v1945_v12 }
 0x334   : > { %1954 = vst [vmem:[%s3367_s29 + $0x28] sm:$0xff] %v1946_v34  ;;  %v2004_v0 = vmul.f32 %v1982_v11, %v1946_v34 }
 0x335   : > { %v2010_v44 = vadd.f32 %v2009_v30, %v2003_v43  ;;  %v2020_v4 = vmul.f32 %v2003_v43, %v1945_v12 }
 0x336   : > { %v2021_v2 = vmul.f32 %v2004_v0, %v1946_v34 }
 0x337   : > { %v2027_v54 = vadd.f32 %v2026_v33, %v2020_v4  ;;  %v2011_v45 = vadd.f32 %v2010_v44, %v2004_v0 }
 0x339   : > { %v2028_v10 = vadd.f32 %v2027_v54, %v2021_v2 }
 0x33a   : > { %v1936_v48 = vpop.f32.mrb[2].mxu1 }
 0x33b   : > { %v1937_v50 = vadd.f32 %v1936_v48, %v3353_v47  ;;  %v1938_v7 = vpop.f32.mrb[3].mxu1 }
 0x33c   : > { %v1939_v55 = vadd.f32 %v1938_v7, %v3353_v47  ;;  %v2041_v47 = vld [vmem:[%s370_s8] sm:$0xff] }
 0x33d   : > { %v1947_v13 = vmax.f32 %v1937_v50, 0.0 }
 0x33e   : > { %v1948_v59 = vmax.f32 %v1939_v55, 0.0 }
 0x33f   : > { %1955 = vst [vmem:[%s3367_s29 + $0x30] sm:$0xff] %v1947_v13  ;;  %v2005_v58 = vmul.f32 %v1986_v51, %v1947_v13 }
 0x340   : > { %1956 = vst [vmem:[%s3367_s29 + $0x38] sm:$0xff] %v1948_v59  ;;  %v2006_v25 = vmul.f32 %v1990_v56, %v1948_v59 }
 0x341   : > { %v2022_v49 = vmul.f32 %v2005_v58, %v1947_v13  ;;  %v2012_v20 = vadd.f32 %v2011_v45, %v2005_v58 }
 0x342   : > { %v2023_v35 = vmul.f32 %v2006_v25, %v1948_v59 }
 0x343   : > { %v2013_v52 = vadd.f32 %v2012_v20, %v2006_v25  ;;  %v2029_v37 = vadd.f32 %v2028_v10, %v2022_v49 }
 0x345   : > { %2014 = vadd.xlane.f32.xlu1 %v2013_v52  ;;  %v2030_v62 = vadd.f32 %v2029_v37, %v2023_v35 }
 0x347   : > { %2031 = vadd.xlane.f32.xlu0 %v2030_v62 }
 0x3d2   : > { %v2015_v46 = vpop.xlane.xlu1 %2014 }
 0x3d4   : > { %v2032_v41 = vpop.xlane.xlu0 %2031 }
 0x3d5   : > { %v2034_v3 = vsel %vm2033_vm0, %v2015_v46, %v2032_v41 }
 0x3d6   : > { %v2042_v16 = vadd.f32 %v2041_v47, %v2034_v3 }
 0x3d8   : > { %2044 = vst.msk [vmem:[%s370_s8] sm:$0xff] %vm2039_vm15, %v2042_v16 }
 0x3d9 PF: > { %s17_s23 = sadd.s32 1, %s2410_s23   ;;  %s3473_s21 = smov %s2406_s22 }
 0x3da   : > { %p14_p5 = scmp.ge.s32.totalorder %s17_s23, 4   ;;  %s3474_s22 = smov %s3476_s24 }
 0x3dc   :  { %16 = sbr.rel (!%p14_p5) target bundleno = 2 (0x2), region = 92 }

</bundles_post_ra>
